<compile_context>
chip_gen: v7x
topology: tpu7x:2x2x1
jax: 0.10.0
libtpu: 0.0.40
codegen_flags: <defaults>
</compile_context>

<pallas_src>
import functools

import jax
import jax.numpy as jnp
from jax.experimental import pallas as pl
from jax.experimental.pallas import tpu as pltpu

LANE = 128      # pad feature / hidden / class dims to full lane width (lane-dense stores)
ROW_TILE = 256  # M tile over A's rows (output rows); 128-multiple (v5e) and MXU-wide (v6e/v7x)
K_TILE = 512    # contraction tile over A's columns; decouples VMEM footprint from N


def _round_up(x, m):
    return (x + m - 1) // m * m


# ----------------------------- kernels --------------------------------------

def layer1_kernel(a_ref, xw_ref, b1_ref, w2_ref, o_ref, acc_ref):
    # acc += A[i, k] @ XW1[k]  (bf16 operands, f32 MXU accumulation)
    @pl.when(pl.program_id(1) == 0)
    def _():
        acc_ref[...] = jnp.zeros_like(acc_ref)

    acc_ref[...] += jnp.dot(a_ref[...], xw_ref[...],
                            preferred_element_type=jnp.float32)

    # Last K step: H = relu(acc + b1); (two dropouts are identity at eval); out = H @ W2.
    @pl.when(pl.program_id(1) == pl.num_programs(1) - 1)
    def _():
        h = jnp.maximum(acc_ref[...] + b1_ref[...], 0.0)
        o_ref[...] = jnp.dot(h.astype(jnp.bfloat16), w2_ref[...],
                             preferred_element_type=jnp.float32).astype(jnp.bfloat16)


def layer2_kernel(a_ref, hw_ref, b2_ref, o_ref, acc_ref, *, num_classes):
    # acc += A[i, k] @ (H W2)[k]
    @pl.when(pl.program_id(1) == 0)
    def _():
        acc_ref[...] = jnp.zeros_like(acc_ref)

    acc_ref[...] += jnp.dot(a_ref[...], hw_ref[...],
                            preferred_element_type=jnp.float32)

    # Last K step: z = acc + b2; log_softmax over the real classes only.
    @pl.when(pl.program_id(1) == pl.num_programs(1) - 1)
    def _():
        z = acc_ref[...] + b2_ref[...]
        col = jax.lax.broadcasted_iota(jnp.int32, z.shape, dimension=1)
        z = jnp.where(col < num_classes, z, -1e30)          # mask padded class lanes
        m = jnp.max(z, axis=1, keepdims=True)
        s = z - m
        lse = jnp.log(jnp.sum(jnp.exp(s), axis=1, keepdims=True))
        o_ref[...] = s - lse


# ----------------------------- wrapper ---------------------------------------

@jax.jit
def gcn_net_forward(a_hat_p, x, w1, b1, w2, b2):
    """a_hat_p: (N_pad, N_pad) bf16 symmetric-normalized adjacency (padded, zero-filled)."""
    N, F_in = x.shape
    N_pad = a_hat_p.shape[0]
    H = w1.shape[1]
    C = w2.shape[1]
    tm, tk = ROW_TILE, K_TILE
    assert N_pad % tm == 0 and N_pad % tk == 0

    H_pad = _round_up(H, LANE)
    C_pad = _round_up(C, LANE)

    # X @ W1 is a tiny (N x F)(F x 16) matmul: leave it to XLA (one fewer launch),
    # then pad once into a lane-dense bf16 buffer for the streamed A pass.
    xw1 = jnp.dot(x.astype(jnp.float32), w1.astype(jnp.float32),
                  preferred_element_type=jnp.float32)
    xw1_p = jnp.zeros((N_pad, H_pad), jnp.bfloat16).at[:N, :H].set(xw1.astype(jnp.bfloat16))

    w2_p = jnp.zeros((H_pad, C_pad), jnp.bfloat16).at[:H, :C].set(w2.astype(jnp.bfloat16))
    b1_p = jnp.zeros((1, H_pad), jnp.float32).at[:, :H].set(b1.reshape(1, H).astype(jnp.float32))
    b2_p = jnp.zeros((1, C_pad), jnp.float32).at[:, :C].set(b2.reshape(1, C).astype(jnp.float32))

    grid = (N_pad // tm, N_pad // tk)
    # Rows shard across TCs (megacore); K is the reduction axis, kept last.
    # Per-step VMEM: A (256x512 bf16 x2) + K-block (512x128 bf16 x2) + W2/biases/out + f32 acc
    # ~= 1.3 MiB -> fits the default scoped-VMEM limit on v5e/v6e/v7x; no override needed.
    cp = pltpu.CompilerParams(dimension_semantics=("parallel", "arbitrary"))

    a_map = lambda i, k: (i, k)
    k_map = lambda i, k: (k, 0)
    rep_map = lambda i, k: (0, 0)
    out_map = lambda i, k: (i, 0)

    # Pass 1 over A: HW2 = relu(A @ XW1 + b1) @ W2
    hw2 = pl.pallas_call(
        layer1_kernel,
        out_shape=jax.ShapeDtypeStruct((N_pad, C_pad), jnp.bfloat16),
        grid=grid,
        in_specs=[pl.BlockSpec((tm, tk), a_map),
                  pl.BlockSpec((tk, H_pad), k_map),
                  pl.BlockSpec((1, H_pad), rep_map),
                  pl.BlockSpec((H_pad, C_pad), rep_map)],
        out_specs=pl.BlockSpec((tm, C_pad), out_map),
        scratch_shapes=[pltpu.VMEM((tm, H_pad), jnp.float32)],
        compiler_params=cp,
    )(a_hat_p, xw1_p, b1_p, w2_p)

    # Pass 2 over A: out = log_softmax(A @ HW2 + b2)
    out_p = pl.pallas_call(
        functools.partial(layer2_kernel, num_classes=C),
        out_shape=jax.ShapeDtypeStruct((N_pad, C_pad), jnp.float32),
        grid=grid,
        in_specs=[pl.BlockSpec((tm, tk), a_map),
                  pl.BlockSpec((tk, C_pad), k_map),
                  pl.BlockSpec((1, C_pad), rep_map)],
        out_specs=pl.BlockSpec((tm, C_pad), out_map),
        scratch_shapes=[pltpu.VMEM((tm, C_pad), jnp.float32)],
        compiler_params=cp,
    )(a_hat_p, hw2, b2_p)

    return out_p[:N, :C]


# ----------------------------- graph glue (plain JAX) ------------------------

def build_normalized_adjacency(edge_index, edge_weight, num_nodes, padded_nodes,
                               dtype=jnp.bfloat16):
    """PyG gcn_norm: self-loops (w=1), symmetric D^-1/2 A D^-1/2, scattered directly
    into the padded (padded_nodes, padded_nodes) buffer with a single fused cast
    (no separate pad+cast pass over the N^2 matrix)."""
    src = edge_index[0].astype(jnp.int32)
    dst = edge_index[1].astype(jnp.int32)
    w = edge_weight.astype(jnp.float32)

    loop_idx = jnp.arange(num_nodes, dtype=jnp.int32)
    src = jnp.concatenate([src, loop_idx])
    dst = jnp.concatenate([dst, loop_idx])
    w = jnp.concatenate([w, jnp.ones((num_nodes,), jnp.float32)])

    deg = jnp.zeros((num_nodes,), jnp.float32).at[dst].add(w)
    deg_inv_sqrt = jnp.where(deg > 0, jax.lax.rsqrt(deg), 0.0)
    norm = deg_inv_sqrt[src] * w * deg_inv_sqrt[dst]

    # out[dst] += norm * x[src]  ==>  A_hat[dst, src] = norm
    # TODO(synk): for large sparse graphs (E << N^2) replace this densification with a
    # scalar-prefetch CSR row-gather kernel, and compress the streamed A (fp8 on v7x,
    # int8 on v5e/v6e) to halve its HBM traffic in the two A passes.
    a = jnp.zeros((padded_nodes, padded_nodes), jnp.float32).at[dst, src].add(norm)
    return a.astype(dtype)


def reference_forward(a_hat, x, w1, b1, w2, b2):
    h = jnp.maximum(a_hat @ (x @ w1) + b1, 0.0)
    z = a_hat @ (h @ w2) + b2
    return jax.nn.log_softmax(z, axis=1)


if __name__ == "__main__":
    key = jax.random.PRNGKey(0)

    N = 256           # nodes
    F_IN = 16         # num_feature
    HID = 16          # hidden3 (fixed in module __init__)
    C = 8             # num_classes
    E = 1024          # edges

    ks = jax.random.split(key, 7)
    x = jax.random.normal(ks[0], (N, F_IN), dtype=jnp.float32)
    src = jax.random.randint(ks[1], (E,), 0, N, dtype=jnp.int32)
    dst = jax.random.randint(ks[2], (E,), 0, N, dtype=jnp.int32)
    edge_index = jnp.stack([src, dst], axis=0)                  # [2, E]
    edge_weight = jax.random.uniform(ks[3], (E,), dtype=jnp.float32) + 0.1

    w1 = jax.random.normal(ks[4], (F_IN, HID), dtype=jnp.float32) * 0.1
    b1 = jnp.zeros((1, HID), dtype=jnp.float32)
    w2 = jax.random.normal(ks[5], (HID, C), dtype=jnp.float32) * 0.1
    b2 = jnp.zeros((1, C), dtype=jnp.float32)

    N_pad = _round_up(N, max(ROW_TILE, K_TILE))
    a_hat_p = build_normalized_adjacency(edge_index, edge_weight, N, N_pad,
                                         dtype=jnp.bfloat16)

    out = gcn_net_forward(a_hat_p, x, w1, b1, w2, b2)
    out = jax.block_until_ready(out)

    # sanity: shape, rows exp-sum to ~1, and bf16 kernel ~ f32 reference
    assert out.shape == (N, C)
    row_sums = jnp.sum(jnp.exp(out), axis=1)
    assert bool(jnp.all(jnp.abs(row_sums - 1.0) < 1e-3))
    a_ref = build_normalized_adjacency(edge_index, edge_weight, N, N, dtype=jnp.float32)
    ref = reference_forward(a_ref, x, w1, b1, w2, b2)
    assert bool(jnp.max(jnp.abs(out - ref)) < 0.1)

    print("KERNEL_OK")
</pallas_src>

<mosaic_0001>
module attributes {stable_mosaic.version = 11 : i64} {
  func.func @layer1_kernel(%arg0: i32, %arg1: i32, %arg2: memref<256x512xbf16, #tpu.memory_space<vmem>>, %arg3: memref<512x128xbf16, #tpu.memory_space<vmem>>, %arg4: memref<1x128xf32, #tpu.memory_space<vmem>>, %arg5: memref<128x128xbf16, #tpu.memory_space<vmem>>, %arg6: memref<256x128xbf16, #tpu.memory_space<vmem>>, %arg7: memref<256x128xf32, #tpu.memory_space<vmem>>) attributes {dimension_semantics = [#tpu.dimension_semantics<parallel>, #tpu.dimension_semantics<arbitrary>], iteration_bounds = array<i64: 2, 1>, scalar_prefetch = 0 : i64, scratch_operands = 1 : i64, tpu.core_type = #tpu.core_type<tc>, window_params = [{transform_indices = @transform_0, window_bounds = array<i64: 256, 512>}, {transform_indices = @transform_1, window_bounds = array<i64: 512, 128>}, {pipeline_mode = #tpu.pipeline_mode<synchronous>, transform_indices = @transform_2, window_bounds = array<i64: 1, 128>}, {pipeline_mode = #tpu.pipeline_mode<synchronous>, transform_indices = @transform_3, window_bounds = array<i64: 128, 128>}, {transform_indices = @transform_4, window_bounds = array<i64: 256, 128>}]} {
    %c0_i32 = arith.constant 0 : i32
    %0 = arith.cmpi eq, %arg1, %c0_i32 : i32
    %1 = arith.extui %0 : i1 to i32
    %c0_i32_0 = arith.constant 0 : i32
    %2 = arith.cmpi ne, %1, %c0_i32_0 : i32
    scf.if %2 {
      %cst_10 = arith.constant 0.000000e+00 : f32
      %12 = vector.broadcast %cst_10 : f32 to vector<256x128xf32>
      %c0_11 = arith.constant 0 : index
      %c0_12 = arith.constant 0 : index
      %13 = vector.load %arg7[%c0_11, %c0_12] : memref<256x128xf32, #tpu.memory_space<vmem>>, vector<256x128xf32>
      tpu.vector_store %arg7[%c0_11, %c0_12], %12 {strides = array<i32>} : memref<256x128xf32, #tpu.memory_space<vmem>>, vector<256x128xf32>,
    } else {
    }
    %c0 = arith.constant 0 : index
    %c0_1 = arith.constant 0 : index
    %3 = vector.load %arg7[%c0, %c0_1] : memref<256x128xf32, #tpu.memory_space<vmem>>, vector<256x128xf32>
    %c0_2 = arith.constant 0 : index
    %c0_3 = arith.constant 0 : index
    %4 = vector.load %arg2[%c0_2, %c0_3] : memref<256x512xbf16, #tpu.memory_space<vmem>>, vector<256x512xbf16>
    %c0_4 = arith.constant 0 : index
    %c0_5 = arith.constant 0 : index
    %5 = vector.load %arg3[%c0_4, %c0_5] : memref<512x128xbf16, #tpu.memory_space<vmem>>, vector<512x128xbf16>
    %cst = arith.constant dense<0.000000e+00> : vector<256x128xf32>
    %6 = tpu.matmul %4, %5, %cst {dimension_numbers = #tpu.dot_dimension_numbers<[1], [0], [0], [1], [0, 0, 1, 1], [], []>} : vector<256x512xbf16>, vector<512x128xbf16>, vector<256x128xf32> -> vector<256x128xf32>
    %7 = arith.addf %3, %6 : vector<256x128xf32>
    %c0_6 = arith.constant 0 : index
    %c0_7 = arith.constant 0 : index
    %8 = vector.load %arg7[%c0_6, %c0_7] : memref<256x128xf32, #tpu.memory_space<vmem>>, vector<256x128xf32>
    tpu.vector_store %arg7[%c0_6, %c0_7], %7 {strides = array<i32>} : memref<256x128xf32, #tpu.memory_space<vmem>>, vector<256x128xf32>,
    %c0_i32_8 = arith.constant 0 : i32
    %9 = arith.cmpi eq, %arg1, %c0_i32_8 : i32
    %10 = arith.extui %9 : i1 to i32
    %c0_i32_9 = arith.constant 0 : i32
    %11 = arith.cmpi ne, %10, %c0_i32_9 : i32
    scf.if %11 {
      %c0_10 = arith.constant 0 : index
      %c0_11 = arith.constant 0 : index
      %12 = vector.load %arg7[%c0_10, %c0_11] : memref<256x128xf32, #tpu.memory_space<vmem>>, vector<256x128xf32>
      %c0_12 = arith.constant 0 : index
      %c0_13 = arith.constant 0 : index
      %13 = vector.load %arg4[%c0_12, %c0_13] : memref<1x128xf32, #tpu.memory_space<vmem>>, vector<1x128xf32>
      %14 = vector.broadcast %13 : vector<1x128xf32> to vector<256x128xf32>
      %15 = arith.addf %12, %14 : vector<256x128xf32>
      %cst_14 = arith.constant 0.000000e+00 : f32
      %16 = vector.broadcast %cst_14 : f32 to vector<256x128xf32>
      %17 = arith.maximumf %15, %16 : vector<256x128xf32>
      %18 = arith.truncf %17 : vector<256x128xf32> to vector<256x128xbf16>
      %c0_15 = arith.constant 0 : index
      %c0_16 = arith.constant 0 : index
      %19 = vector.load %arg5[%c0_15, %c0_16] : memref<128x128xbf16, #tpu.memory_space<vmem>>, vector<128x128xbf16>
      %cst_17 = arith.constant dense<0.000000e+00> : vector<256x128xf32>
      %20 = tpu.matmul %18, %19, %cst_17 {dimension_numbers = #tpu.dot_dimension_numbers<[1], [0], [0], [1], [0, 0, 1, 1], [], []>} : vector<256x128xbf16>, vector<128x128xbf16>, vector<256x128xf32> -> vector<256x128xf32>
      %21 = arith.truncf %20 : vector<256x128xf32> to vector<256x128xbf16>
      %c0_18 = arith.constant 0 : index
      %c0_19 = arith.constant 0 : index
      %22 = vector.load %arg6[%c0_18, %c0_19] : memref<256x128xbf16, #tpu.memory_space<vmem>>, vector<256x128xbf16>
      tpu.vector_store %arg6[%c0_18, %c0_19], %21 {strides = array<i32>} : memref<256x128xbf16, #tpu.memory_space<vmem>>, vector<256x128xbf16>,
    } else {
    }
    return
  }
  func.func @transform_0(%arg0: i32, %arg1: i32) -> (i32, i32) {
    %c0_i32 = arith.constant 0 : i32
    return %arg0, %arg1 : i32, i32
  }
  func.func @transform_1(%arg0: i32, %arg1: i32) -> (i32, i32) {
    %c0_i32 = arith.constant 0 : i32
    %c0_i32_0 = arith.constant 0 : i32
    return %arg1, %c0_i32 : i32, i32
  }
  func.func @transform_2(%arg0: i32, %arg1: i32) -> (i32, i32) {
    %c0_i32 = arith.constant 0 : i32
    %c0_i32_0 = arith.constant 0 : i32
    %c0_i32_1 = arith.constant 0 : i32
    return %c0_i32, %c0_i32_0 : i32, i32
  }
  func.func @transform_3(%arg0: i32, %arg1: i32) -> (i32, i32) {
    %c0_i32 = arith.constant 0 : i32
    %c0_i32_0 = arith.constant 0 : i32
    %c0_i32_1 = arith.constant 0 : i32
    return %c0_i32, %c0_i32_0 : i32, i32
  }
  func.func @transform_4(%arg0: i32, %arg1: i32) -> (i32, i32) {
    %c0_i32 = arith.constant 0 : i32
    %c0_i32_0 = arith.constant 0 : i32
    return %arg0, %c0_i32 : i32, i32
  }
}

module attributes {stable_mosaic.version = 11 : i64} {
  func.func @layer2_kernel(%arg0: i32, %arg1: i32, %arg2: memref<256x512xbf16, #tpu.memory_space<vmem>>, %arg3: memref<512x128xbf16, #tpu.memory_space<vmem>>, %arg4: memref<1x128xf32, #tpu.memory_space<vmem>>, %arg5: memref<256x128xf32, #tpu.memory_space<vmem>>, %arg6: memref<256x128xf32, #tpu.memory_space<vmem>>) attributes {dimension_semantics = [#tpu.dimension_semantics<parallel>, #tpu.dimension_semantics<arbitrary>], iteration_bounds = array<i64: 2, 1>, scalar_prefetch = 0 : i64, scratch_operands = 1 : i64, tpu.core_type = #tpu.core_type<tc>, window_params = [{transform_indices = @transform_0, window_bounds = array<i64: 256, 512>}, {transform_indices = @transform_1, window_bounds = array<i64: 512, 128>}, {pipeline_mode = #tpu.pipeline_mode<synchronous>, transform_indices = @transform_2, window_bounds = array<i64: 1, 128>}, {transform_indices = @transform_3, window_bounds = array<i64: 256, 128>}]} {
    %c0_i32 = arith.constant 0 : i32
    %0 = arith.cmpi eq, %arg1, %c0_i32 : i32
    %1 = arith.extui %0 : i1 to i32
    %c0_i32_0 = arith.constant 0 : i32
    %2 = arith.cmpi ne, %1, %c0_i32_0 : i32
    scf.if %2 {
      %cst_10 = arith.constant 0.000000e+00 : f32
      %12 = vector.broadcast %cst_10 : f32 to vector<256x128xf32>
      %c0_11 = arith.constant 0 : index
      %c0_12 = arith.constant 0 : index
      %13 = vector.load %arg6[%c0_11, %c0_12] : memref<256x128xf32, #tpu.memory_space<vmem>>, vector<256x128xf32>
      tpu.vector_store %arg6[%c0_11, %c0_12], %12 {strides = array<i32>} : memref<256x128xf32, #tpu.memory_space<vmem>>, vector<256x128xf32>,
    } else {
    }
    %c0 = arith.constant 0 : index
    %c0_1 = arith.constant 0 : index
    %3 = vector.load %arg6[%c0, %c0_1] : memref<256x128xf32, #tpu.memory_space<vmem>>, vector<256x128xf32>
    %c0_2 = arith.constant 0 : index
    %c0_3 = arith.constant 0 : index
    %4 = vector.load %arg2[%c0_2, %c0_3] : memref<256x512xbf16, #tpu.memory_space<vmem>>, vector<256x512xbf16>
    %c0_4 = arith.constant 0 : index
    %c0_5 = arith.constant 0 : index
    %5 = vector.load %arg3[%c0_4, %c0_5] : memref<512x128xbf16, #tpu.memory_space<vmem>>, vector<512x128xbf16>
    %cst = arith.constant dense<0.000000e+00> : vector<256x128xf32>
    %6 = tpu.matmul %4, %5, %cst {dimension_numbers = #tpu.dot_dimension_numbers<[1], [0], [0], [1], [0, 0, 1, 1], [], []>} : vector<256x512xbf16>, vector<512x128xbf16>, vector<256x128xf32> -> vector<256x128xf32>
    %7 = arith.addf %3, %6 : vector<256x128xf32>
    %c0_6 = arith.constant 0 : index
    %c0_7 = arith.constant 0 : index
    %8 = vector.load %arg6[%c0_6, %c0_7] : memref<256x128xf32, #tpu.memory_space<vmem>>, vector<256x128xf32>
    tpu.vector_store %arg6[%c0_6, %c0_7], %7 {strides = array<i32>} : memref<256x128xf32, #tpu.memory_space<vmem>>, vector<256x128xf32>,
    %c0_i32_8 = arith.constant 0 : i32
    %9 = arith.cmpi eq, %arg1, %c0_i32_8 : i32
    %10 = arith.extui %9 : i1 to i32
    %c0_i32_9 = arith.constant 0 : i32
    %11 = arith.cmpi ne, %10, %c0_i32_9 : i32
    scf.if %11 {
      %c0_10 = arith.constant 0 : index
      %c0_11 = arith.constant 0 : index
      %12 = vector.load %arg6[%c0_10, %c0_11] : memref<256x128xf32, #tpu.memory_space<vmem>>, vector<256x128xf32>
      %c0_12 = arith.constant 0 : index
      %c0_13 = arith.constant 0 : index
      %13 = vector.load %arg4[%c0_12, %c0_13] : memref<1x128xf32, #tpu.memory_space<vmem>>, vector<1x128xf32>
      %14 = vector.broadcast %13 : vector<1x128xf32> to vector<256x128xf32>
      %15 = arith.addf %12, %14 : vector<256x128xf32>
      %16 = tpu.iota {dimensions = array<i32: 1>} : vector<256x128xi32>
      %c8_i32 = arith.constant 8 : i32
      %17 = vector.broadcast %c8_i32 : i32 to vector<256x128xi32>
      %18 = arith.cmpi slt, %16, %17 : vector<256x128xi32>
      %cst_14 = arith.constant -1.000000e+30 : f32
      %19 = vector.broadcast %cst_14 : f32 to vector<256x128xf32>
      %20 = arith.select %18, %15, %19 : vector<256x128xi1>, vector<256x128xf32>
      %cst_15 = arith.constant dense<0xFF800000> : vector<256xf32>
      %21 = vector.multi_reduction <maximumf>, %20, %cst_15 [1] : vector<256x128xf32> to vector<256xf32>
      %22 = vector.shape_cast %21 : vector<256xf32> to vector<256x1xf32>
      %23 = vector.broadcast %22 : vector<256x1xf32> to vector<256x128xf32>
      %24 = arith.subf %20, %23 : vector<256x128xf32>
      %25 = math.exp %24 : vector<256x128xf32>
      %cst_16 = arith.constant dense<0.000000e+00> : vector<256xf32>
      %26 = vector.multi_reduction <add>, %25, %cst_16 [1] : vector<256x128xf32> to vector<256xf32>
      %27 = vector.shape_cast %26 : vector<256xf32> to vector<256x1xf32>
      %28 = math.log %27 : vector<256x1xf32>
      %29 = vector.broadcast %28 : vector<256x1xf32> to vector<256x128xf32>
      %30 = arith.subf %24, %29 : vector<256x128xf32>
      %c0_17 = arith.constant 0 : index
      %c0_18 = arith.constant 0 : index
      %31 = vector.load %arg5[%c0_17, %c0_18] : memref<256x128xf32, #tpu.memory_space<vmem>>, vector<256x128xf32>
      tpu.vector_store %arg5[%c0_17, %c0_18], %30 {strides = array<i32>} : memref<256x128xf32, #tpu.memory_space<vmem>>, vector<256x128xf32>,
    } else {
    }
    return
  }
  func.func @transform_0(%arg0: i32, %arg1: i32) -> (i32, i32) {
    %c0_i32 = arith.constant 0 : i32
    return %arg0, %arg1 : i32, i32
  }
  func.func @transform_1(%arg0: i32, %arg1: i32) -> (i32, i32) {
    %c0_i32 = arith.constant 0 : i32
    %c0_i32_0 = arith.constant 0 : i32
    return %arg1, %c0_i32 : i32, i32
  }
  func.func @transform_2(%arg0: i32, %arg1: i32) -> (i32, i32) {
    %c0_i32 = arith.constant 0 : i32
    %c0_i32_0 = arith.constant 0 : i32
    %c0_i32_1 = arith.constant 0 : i32
    return %c0_i32, %c0_i32_0 : i32, i32
  }
  func.func @transform_3(%arg0: i32, %arg1: i32) -> (i32, i32) {
    %c0_i32 = arith.constant 0 : i32
    %c0_i32_0 = arith.constant 0 : i32
    return %arg0, %c0_i32 : i32, i32
  }
}

</mosaic_0001>

<bundles_post_ra>
// kernel: gcn_net_forward.3
= control target key start
LH: loop header
LB: loop body
LE: loop exit
PB: predicated region body
PF: predicated region fallthrough
CT: control target
= control target key end

     0   :  { %s2528_s12 = smov 0   ;;  %s2530_s13 = smov 0   ;;  %s3124_s0 = inlined_call_operand.vmem [shape: bf16[512,512], index: 0, kind: input, shape index: {}]   ;;  %s3125_s1 = inlined_call_operand.vmem [shape: bf16[512,128], index: 1, kind: input, shape index: {}]   ;;  %s3126_s2 = inlined_call_operand.vmem [shape: f32[1,128], index: 2, kind: input, shape index: {}]   ;;  %s3127_s3 = inlined_call_operand.vmem [shape: f32[512,128], index: 3, kind: output, shape index: {}]  }
   0x1   :  { %s2532_s14 = smov 0  }
   0x2 LB: > { %s25_s15 = sadd.s32 1, %s2502_s13  ;;  %p1874_p0 = scmp.ge.s32.totalorder %s2506_s14, 1  ;;  %s2506_s14 = sphi %s2532_s14, %s13_s14   ;;  %s2502_s13 = sphi %s2530_s13, %s3129_s13   ;;  %s2498_s12 = sphi %s2528_s12, %s3128_s12  }
   0x3   : > { %p27_p1 = scmp.ge.s32.totalorder %s25_s15, 2  ;;  %p169_p2 = scmp.lt.s32.totalorder %s2506_s14, 3 }
   0x5   : > { %s3131_s15 = smov (%p27_p1, %s25_s15), 0  ;;  %p170_p3 = pnand %p1874_p0, %p169_p2 }
   0x6   : > { %v2228_v0 = vld [vmem:[%s3125_s1 + $0x40] sm:$0xff] (!%p170_p3)   ;;  %v2232_v4 = vld [vmem:[%s3125_s1 + $0x48] sm:$0xff] (!%p170_p3)   ;;  %v2236_v8 = vld [vmem:[%s3125_s1 + $0x50] sm:$0xff] (!%p170_p3)   ;;  %s1875_s25 = sshll.u32 (!%p170_p3), %s2498_s12, 5 }
   0x7   : > { %173 = sbr.rel (%p170_p3) target bundleno = 698 (0x2ba), region = 32  ;;  %v2229_v1 = vld [vmem:[%s3125_s1 + $0xc0] sm:$0xff] (!%p170_p3)   ;;  %1980 = vmatprep.subr.bf16.mxu0 (!%p170_p3), %v2228_v0  ;;  %v2233_v5 = vld [vmem:[%s3125_s1 + $0xc8] sm:$0xff] (!%p170_p3)   ;;  %v2237_v9 = vld [vmem:[%s3125_s1 + $0xd0] sm:$0xff] (!%p170_p3)   ;;  %p205_p4 = scmp.lt.s32.totalorder (!%p170_p3), %s1875_s25, 63 }
   0x8   : > { %v2230_v2 = vld [vmem:[%s3125_s1] sm:$0xff] (!%p170_p3)   ;;  %2092 = vmatprep.subr.bf16.mxu1 (!%p170_p3), %v2229_v1  ;;  %v2234_v6 = vld [vmem:[%s3125_s1 + $0x8] sm:$0xff] (!%p170_p3)   ;;  %v2238_v10 = vld [vmem:[%s3125_s1 + $0x10] sm:$0xff] (!%p170_p3)  }
   0x9   : > { %v2231_v3 = vld [vmem:[%s3125_s1 + $0x80] sm:$0xff] (!%p170_p3)   ;;  %1981 = vmatpush3.bf16.msra.mxu0 (!%p170_p3), %v2230_v2  ;;  %v2235_v7 = vld [vmem:[%s3125_s1 + $0x88] sm:$0xff] (!%p170_p3)   ;;  %v2239_v11 = vld [vmem:[%s3125_s1 + $0x90] sm:$0xff] (!%p170_p3)  }
   0xa   : > { %2093 = vmatpush3.bf16.msra.mxu1 (!%p170_p3), %v2231_v3  ;;  %1982 = vmatprep.subr.bf16.mxu0 (!%p170_p3), %v2232_v4  ;;  %v2240_v12 = vld [vmem:[%s3125_s1 + $0x58] sm:$0xff] (!%p170_p3)   ;;  %v2244_v16 = vld [vmem:[%s3125_s1 + $0x60] sm:$0xff] (!%p170_p3)   ;;  %v2248_v20 = vld [vmem:[%s3125_s1 + $0x68] sm:$0xff] (!%p170_p3)  }
   0xb   : > { %2094 = vmatprep.subr.bf16.mxu1 (!%p170_p3), %v2233_v5  ;;  %v2241_v13 = vld [vmem:[%s3125_s1 + $0xd8] sm:$0xff] (!%p170_p3)   ;;  %v2245_v17 = vld [vmem:[%s3125_s1 + $0xe0] sm:$0xff] (!%p170_p3)   ;;  %v2249_v21 = vld [vmem:[%s3125_s1 + $0xe8] sm:$0xff] (!%p170_p3)  }
   0xc   : > { %v2242_v14 = vld [vmem:[%s3125_s1 + $0x18] sm:$0xff] (!%p170_p3)   ;;  %v2246_v18 = vld [vmem:[%s3125_s1 + $0x20] sm:$0xff] (!%p170_p3)   ;;  %v2250_v22 = vld [vmem:[%s3125_s1 + $0x28] sm:$0xff] (!%p170_p3)  }
   0xd   : > { %1983 = vmatpush3.bf16.msra.mxu0 (!%p170_p3), %v2234_v6  ;;  %v2243_v15 = vld [vmem:[%s3125_s1 + $0x98] sm:$0xff] (!%p170_p3)   ;;  %v2247_v19 = vld [vmem:[%s3125_s1 + $0xa0] sm:$0xff] (!%p170_p3)   ;;  %v2251_v23 = vld [vmem:[%s3125_s1 + $0xa8] sm:$0xff] (!%p170_p3)  }
   0xe   : > { %2095 = vmatpush3.bf16.msra.mxu1 %v2235_v7  ;;  %1984 = vmatprep.subr.bf16.mxu0 %v2236_v8  ;;  %s3133_s25 = smov (!%p205_p4, %s1875_s25), 63  ;;  %v2252_v24 = vld [vmem:[%s3125_s1 + $0x70] sm:$0xff]   ;;  %v2256_v28 = vld [vmem:[%s3125_s1 + $0x78] sm:$0xff]  }
   0xf   : > { %2096 = vmatprep.subr.bf16.mxu1 %v2237_v9  ;;  %v2253_v25 = vld [vmem:[%s3125_s1 + $0xf0] sm:$0xff]   ;;  %s1979_s24 = sshll.u32 %s3133_s25, 4  ;;  %v2257_v29 = vld [vmem:[%s3125_s1 + $0xf8] sm:$0xff]   ;;  %s1879_s17 = sshll.u32 %s3133_s25, 3 }
  0x10   : > { %v2254_v26 = vld [vmem:[%s3125_s1 + $0x30] sm:$0xff]   ;;  %s2645_s12 = scalar_lea.vmem %s3124_s0, %s1979_s24  ;;  %v2258_v30 = vld [vmem:[%s3125_s1 + $0x38] sm:$0xff]   ;;  %s3049_s20 = scalar_lea.vmem %s3127_s3, %s1879_s17 }
  0x11   : > { %1985 = vmatpush3.bf16.msra.mxu0 %v2238_v10  ;;  %v2255_v27 = vld [vmem:[%s3125_s1 + $0xb0] sm:$0xff]   ;;  %v2259_v31 = vld [vmem:[%s3125_s1 + $0xb8] sm:$0xff]  }
  0x12   : > { %2097 = vmatpush3.bf16.msra.mxu1 %v2239_v11  ;;  %1986 = vmatprep.subr.bf16.mxu0 %v2240_v12  ;;  %v2260_v32 = vld [vmem:[%s2645_s12] ss:$16 sps:$4 sm:$0xff]   ;;  %v2262_v33 = vld [vmem:[%s2645_s12 + $0x4] ss:$16 sps:$4 sm:$0xff]   ;;  %v2263_v34 = vld [vmem:[%s2645_s12 + $0x8] ss:$16 sps:$4 sm:$0xff]  }
  0x13   : > { %2098 = vmatprep.subr.bf16.mxu1 %v2241_v13  ;;  %v2265_v35 = vld [vmem:[%s2645_s12 + $0xc] ss:$16 sps:$4 sm:$0xff]   ;;  %968 = vmatprep.mubr.bf16.mxu0 %v2262_v33  ;;  %v2266_v36 = vld [vmem:[%s2645_s12 + $0x24] ss:$16 sps:$4 sm:$0xff]   ;;  %v2270_v38 = vld [vmem:[%s2645_s12 + $0x20] ss:$16 sps:$4 sm:$0xff]  }
  0x14   : > { %1129 = vmatprep.mubr.bf16.mxu1 %v2265_v35  ;;  %v2268_v37 = vld [vmem:[%s2645_s12 + $0x2c] ss:$16 sps:$4 sm:$0xff]   ;;  %v2271_v39 = vld [vmem:[%s2645_s12 + $0x28] ss:$16 sps:$4 sm:$0xff]   ;;  %v2272_v40 = vld [vmem:[%s2645_s12 + $0x44] ss:$16 sps:$4 sm:$0xff]  }
  0x15   : > { %1987 = vmatpush3.bf16.msra.mxu0 %v2242_v14  ;;  %v2274_v41 = vld [vmem:[%s2645_s12 + $0x4c] ss:$16 sps:$4 sm:$0xff]   ;;  %v2276_v42 = vld [vmem:[%s2645_s12 + $0x40] ss:$16 sps:$4 sm:$0xff]   ;;  %v2277_v43 = vld [vmem:[%s2645_s12 + $0x48] ss:$16 sps:$4 sm:$0xff]  }
  0x16   : > { %2099 = vmatpush3.bf16.msra.mxu1 %v2243_v15  ;;  %1988 = vmatprep.subr.bf16.mxu0 %v2244_v16  ;;  %v2278_v44 = vld [vmem:[%s2645_s12 + $0x64] ss:$16 sps:$4 sm:$0xff]   ;;  %v2280_v45 = vld [vmem:[%s2645_s12 + $0x6c] ss:$16 sps:$4 sm:$0xff]   ;;  %v2282_v46 = vld [vmem:[%s2645_s12 + $0x60] ss:$16 sps:$4 sm:$0xff]  }
  0x17   : > { %2100 = vmatprep.subr.bf16.mxu1 %v2245_v17  ;;  %v2283_v47 = vld [vmem:[%s2645_s12 + $0x68] ss:$16 sps:$4 sm:$0xff]   ;;  %v2284_v48 = vld [vmem:[%s2645_s12 + $0x84] ss:$16 sps:$4 sm:$0xff]   ;;  %v2286_v49 = vld [vmem:[%s2645_s12 + $0x8c] ss:$16 sps:$4 sm:$0xff]  }
  0x18   : > { %v2288_v50 = vld [vmem:[%s2645_s12 + $0x80] ss:$16 sps:$4 sm:$0xff]   ;;  %v2289_v51 = vld [vmem:[%s2645_s12 + $0x88] ss:$16 sps:$4 sm:$0xff]   ;;  %v2290_v52 = vld [vmem:[%s2645_s12 + $0xa4] ss:$16 sps:$4 sm:$0xff]  }
  0x19   : > { %1989 = vmatpush3.bf16.msra.mxu0 %v2246_v18  ;;  %v2292_v53 = vld [vmem:[%s2645_s12 + $0xac] ss:$16 sps:$4 sm:$0xff]   ;;  %v2294_v54 = vld [vmem:[%s2645_s12 + $0xa0] ss:$16 sps:$4 sm:$0xff]   ;;  %v2295_v55 = vld [vmem:[%s2645_s12 + $0xa8] ss:$16 sps:$4 sm:$0xff]  }
  0x1a   : > { %2101 = vmatpush3.bf16.msra.mxu1 %v2247_v19  ;;  %1990 = vmatprep.subr.bf16.mxu0 %v2248_v20  ;;  %v2296_v56 = vld [vmem:[%s2645_s12 + $0xc4] ss:$16 sps:$4 sm:$0xff]   ;;  %v2298_v57 = vld [vmem:[%s2645_s12 + $0xcc] ss:$16 sps:$4 sm:$0xff]   ;;  %v2300_v58 = vld [vmem:[%s2645_s12 + $0xc0] ss:$16 sps:$4 sm:$0xff]  }
  0x1b   : > { %2102 = vmatprep.subr.bf16.mxu1 %v2249_v21  ;;  %v2301_v59 = vld [vmem:[%s2645_s12 + $0xc8] ss:$16 sps:$4 sm:$0xff]   ;;  %v2302_v60 = vld [vmem:[%s2645_s12 + $0xe4] ss:$16 sps:$4 sm:$0xff]   ;;  %v2304_v61 = vld [vmem:[%s2645_s12 + $0xec] ss:$16 sps:$4 sm:$0xff]  }
  0x1c   : > { %v2306_v62 = vld [vmem:[%s2645_s12 + $0xe0] ss:$16 sps:$4 sm:$0xff]   ;;  %v2307_v63 = vld [vmem:[%s2645_s12 + $0xe8] ss:$16 sps:$4 sm:$0xff]   ;;  %v2308_v0 = vld [vmem:[%s2645_s12 + $0x104] ss:$16 sps:$4 sm:$0xff]  }
  0x1d   : > { %1991 = vmatpush3.bf16.msra.mxu0 %v2250_v22  ;;  %v2310_v1 = vld [vmem:[%s2645_s12 + $0x10c] ss:$16 sps:$4 sm:$0xff]   ;;  %v2312_v2 = vld [vmem:[%s2645_s12 + $0x100] ss:$16 sps:$4 sm:$0xff]   ;;  %v2313_v3 = vld [vmem:[%s2645_s12 + $0x108] ss:$16 sps:$4 sm:$0xff]  }
  0x1e   : > { %2103 = vmatpush3.bf16.msra.mxu1 %v2251_v23  ;;  %1992 = vmatprep.subr.bf16.mxu0 %v2252_v24  ;;  %v2314_v4 = vld [vmem:[%s2645_s12 + $0x124] ss:$16 sps:$4 sm:$0xff]   ;;  %v2316_v5 = vld [vmem:[%s2645_s12 + $0x12c] ss:$16 sps:$4 sm:$0xff]   ;;  %v2318_v6 = vld [vmem:[%s2645_s12 + $0x120] ss:$16 sps:$4 sm:$0xff]  }
  0x1f   : > { %2104 = vmatprep.subr.bf16.mxu1 %v2253_v25  ;;  %v2319_v7 = vld [vmem:[%s2645_s12 + $0x128] ss:$16 sps:$4 sm:$0xff]   ;;  %v2320_v8 = vld [vmem:[%s2645_s12 + $0x144] ss:$16 sps:$4 sm:$0xff]   ;;  %v2322_v9 = vld [vmem:[%s2645_s12 + $0x14c] ss:$16 sps:$4 sm:$0xff]  }
  0x20   : > { %v2324_v10 = vld [vmem:[%s2645_s12 + $0x140] ss:$16 sps:$4 sm:$0xff]   ;;  %v2325_v11 = vld [vmem:[%s2645_s12 + $0x148] ss:$16 sps:$4 sm:$0xff]   ;;  %v2326_v12 = vld [vmem:[%s2645_s12 + $0x164] ss:$16 sps:$4 sm:$0xff]  }
  0x21   : > { %1993 = vmatpush3.bf16.msra.mxu0 %v2254_v26  ;;  %v2328_v13 = vld [vmem:[%s2645_s12 + $0x16c] ss:$16 sps:$4 sm:$0xff]   ;;  %v2330_v14 = vld [vmem:[%s2645_s12 + $0x160] ss:$16 sps:$4 sm:$0xff]   ;;  %v2331_v15 = vld [vmem:[%s2645_s12 + $0x168] ss:$16 sps:$4 sm:$0xff]  }
  0x22   : > { %2105 = vmatpush3.bf16.msra.mxu1 %v2255_v27  ;;  %1994 = vmatprep.subr.bf16.mxu0 %v2256_v28  ;;  %v2332_v16 = vld [vmem:[%s2645_s12 + $0x184] ss:$16 sps:$4 sm:$0xff]   ;;  %v2334_v17 = vld [vmem:[%s2645_s12 + $0x18c] ss:$16 sps:$4 sm:$0xff]   ;;  %v2336_v18 = vld [vmem:[%s2645_s12 + $0x180] ss:$16 sps:$4 sm:$0xff]  }
  0x23   : > { %2106 = vmatprep.subr.bf16.mxu1 %v2257_v29  ;;  %v2337_v19 = vld [vmem:[%s2645_s12 + $0x188] ss:$16 sps:$4 sm:$0xff]   ;;  %v2338_v20 = vld [vmem:[%s2645_s12 + $0x1a4] ss:$16 sps:$4 sm:$0xff]   ;;  %v2340_v21 = vld [vmem:[%s2645_s12 + $0x1ac] ss:$16 sps:$4 sm:$0xff]  }
  0x24   : > { %v2342_v22 = vld [vmem:[%s2645_s12 + $0x1a0] ss:$16 sps:$4 sm:$0xff]   ;;  %v2343_v23 = vld [vmem:[%s2645_s12 + $0x1a8] ss:$16 sps:$4 sm:$0xff]   ;;  %v2344_v24 = vld [vmem:[%s2645_s12 + $0x1c4] ss:$16 sps:$4 sm:$0xff]  }
  0x25   : > { %1995 = vmatpush3.bf16.msra.mxu0 %v2258_v30  ;;  %v2346_v25 = vld [vmem:[%s2645_s12 + $0x1cc] ss:$16 sps:$4 sm:$0xff]   ;;  %v2348_v26 = vld [vmem:[%s2645_s12 + $0x1c0] ss:$16 sps:$4 sm:$0xff]   ;;  %v2349_v27 = vld [vmem:[%s2645_s12 + $0x1c8] ss:$16 sps:$4 sm:$0xff]  }
  0x26   : > { %2107 = vmatpush3.bf16.msra.mxu1 %v2259_v31  ;;  %v2350_v28 = vld [vmem:[%s2645_s12 + $0x1e4] ss:$16 sps:$4 sm:$0xff]   ;;  %v2352_v29 = vld [vmem:[%s2645_s12 + $0x1ec] ss:$16 sps:$4 sm:$0xff]   ;;  %v2354_v30 = vld [vmem:[%s2645_s12 + $0x1e0] ss:$16 sps:$4 sm:$0xff]  }
  0x27   : > { %v2355_v31 = vld [vmem:[%s2645_s12 + $0x1e8] ss:$16 sps:$4 sm:$0xff]  }
  0x28   : > { %969 = vmatmul.mubr.bf16.vlgmr.msra.gmra.mrb[0].mxu0 %v2260_v32  ;;  %v1396_v32 = vlaneseq }
  0x29   : > { %1130 = vmatmul.mubr.bf16.vlgmr.msra.gmra.mrb[0].mxu1 %v2263_v34  ;;  %976 = vmatprep.mubr.bf16.mxu0 %v2266_v36 }
  0x2a   : > { %1137 = vmatprep.mubr.bf16.mxu1 %v2268_v37 }
  0x30   : > { %977 = vmatmul.mubr.bf16.gmra.mrb[4].mxu0 %v2270_v38 }
  0x31   : > { %1138 = vmatmul.mubr.bf16.gmra.mrb[4].mxu1 %v2271_v39  ;;  %984 = vmatprep.mubr.bf16.mxu0 %v2272_v40  ;;  %v2717_v39 = vand.u32 127, %v1396_v32 }
  0x32   : > { %1145 = vmatprep.mubr.bf16.mxu1 %v2274_v41 }
  0x33   : > { %vm1398_vm0 = vcmp.lt.s32.totalorder %v2717_v39, 8 }
  0x38   : > { %985 = vmatmul.mubr.bf16.gmra.mrb[8].mxu0 %v2276_v42 }
  0x39   : > { %1146 = vmatmul.mubr.bf16.gmra.mrb[8].mxu1 %v2277_v43  ;;  %992 = vmatprep.mubr.bf16.mxu0 %v2278_v44 }
  0x3a   : > { %1153 = vmatprep.mubr.bf16.mxu1 %v2280_v45  ;;  %v2722_v45 = vld [vmem:[%s3126_s2] ss:$0 sm:$0xff] }
  0x40   : > { %993 = vmatmul.mubr.bf16.gmra.mrb[12].mxu0 %v2282_v46 }
  0x41   : > { %1154 = vmatmul.mubr.bf16.gmra.mrb[12].mxu1 %v2283_v47  ;;  %1000 = vmatprep.mubr.bf16.mxu0 %v2284_v48 }
  0x42   : > { %1161 = vmatprep.mubr.bf16.mxu1 %v2286_v49 }
  0x48   : > { %1001 = vmatmul.mubr.bf16.gmra.mrb[16].mxu0 %v2288_v50 }
  0x49   : > { %1162 = vmatmul.mubr.bf16.gmra.mrb[16].mxu1 %v2289_v51  ;;  %1008 = vmatprep.mubr.bf16.mxu0 %v2290_v52 }
  0x4a   : > { %1169 = vmatprep.mubr.bf16.mxu1 %v2292_v53 }
  0x50   : > { %1009 = vmatmul.mubr.bf16.gmra.mrb[20].mxu0 %v2294_v54 }
  0x51   : > { %1170 = vmatmul.mubr.bf16.gmra.mrb[20].mxu1 %v2295_v55  ;;  %1016 = vmatprep.mubr.bf16.mxu0 %v2296_v56 }
  0x52   : > { %1177 = vmatprep.mubr.bf16.mxu1 %v2298_v57 }
  0x58   : > { %1017 = vmatmul.mubr.bf16.gmra.mrb[24].mxu0 %v2300_v58 }
  0x59   : > { %1178 = vmatmul.mubr.bf16.gmra.mrb[24].mxu1 %v2301_v59  ;;  %1024 = vmatprep.mubr.bf16.mxu0 %v2302_v60 }
  0x5a   : > { %1185 = vmatprep.mubr.bf16.mxu1 %v2304_v61 }
  0x60   : > { %1025 = vmatmul.mubr.bf16.gmra.mrb[28].mxu0 %v2306_v62 }
  0x61   : > { %1186 = vmatmul.mubr.bf16.gmra.mrb[28].mxu1 %v2307_v63  ;;  %1032 = vmatprep.mubr.bf16.mxu0 %v2308_v0 }
  0x62   : > { %1193 = vmatprep.mubr.bf16.mxu1 %v2310_v1 }
  0x68   : > { %1033 = vmatmul.mubr.bf16.gmra.mrb[32].mxu0 %v2312_v2 }
  0x69   : > { %1194 = vmatmul.mubr.bf16.gmra.mrb[32].mxu1 %v2313_v3  ;;  %1040 = vmatprep.mubr.bf16.mxu0 %v2314_v4 }
  0x6a   : > { %1201 = vmatprep.mubr.bf16.mxu1 %v2316_v5 }
  0x70   : > { %1041 = vmatmul.mubr.bf16.gmra.mrb[36].mxu0 %v2318_v6 }
  0x71   : > { %1202 = vmatmul.mubr.bf16.gmra.mrb[36].mxu1 %v2319_v7  ;;  %1048 = vmatprep.mubr.bf16.mxu0 %v2320_v8 }
  0x72   : > { %1209 = vmatprep.mubr.bf16.mxu1 %v2322_v9 }
  0x78   : > { %1049 = vmatmul.mubr.bf16.gmra.mrb[40].mxu0 %v2324_v10 }
  0x79   : > { %1210 = vmatmul.mubr.bf16.gmra.mrb[40].mxu1 %v2325_v11  ;;  %1056 = vmatprep.mubr.bf16.mxu0 %v2326_v12 }
  0x7a   : > { %1217 = vmatprep.mubr.bf16.mxu1 %v2328_v13 }
  0x80   : > { %1057 = vmatmul.mubr.bf16.gmra.mrb[44].mxu0 %v2330_v14 }
  0x81   : > { %1218 = vmatmul.mubr.bf16.gmra.mrb[44].mxu1 %v2331_v15  ;;  %1064 = vmatprep.mubr.bf16.mxu0 %v2332_v16 }
  0x82   : > { %1225 = vmatprep.mubr.bf16.mxu1 %v2334_v17 }
  0x88   : > { %1065 = vmatmul.mubr.bf16.gmra.mrb[48].mxu0 %v2336_v18 }
  0x89   : > { %1226 = vmatmul.mubr.bf16.gmra.mrb[48].mxu1 %v2337_v19  ;;  %1072 = vmatprep.mubr.bf16.mxu0 %v2338_v20 }
  0x8a   : > { %1233 = vmatprep.mubr.bf16.mxu1 %v2340_v21 }
  0x90   : > { %1073 = vmatmul.mubr.bf16.gmra.mrb[52].mxu0 %v2342_v22 }
  0x91   : > { %1234 = vmatmul.mubr.bf16.gmra.mrb[52].mxu1 %v2343_v23  ;;  %1080 = vmatprep.mubr.bf16.mxu0 %v2344_v24 }
  0x92   : > { %1241 = vmatprep.mubr.bf16.mxu1 %v2346_v25 }
  0x98   : > { %1081 = vmatmul.mubr.bf16.gmra.mrb[56].mxu0 %v2348_v26 }
  0x99   : > { %1242 = vmatmul.mubr.bf16.gmra.mrb[56].mxu1 %v2349_v27  ;;  %1088 = vmatprep.mubr.bf16.mxu0 %v2350_v28 }
  0x9a   : > { %1249 = vmatprep.mubr.bf16.mxu1 %v2352_v29 }
  0xa0   : > { %1089 = vmatmul.mubr.bf16.gmra.mrb[60].mxu0 %v2354_v30 }
  0xa1   : > { %1250 = vmatmul.mubr.bf16.gmra.mrb[60].mxu1 %v2355_v31 }
  0xfb   : > { %v1996_v33 = vpop.f32.mrb[0].mxu0 }
  0xfc   : > { %v2108_v34 = vpop.f32.mrb[0].mxu1  ;;  %v1997_v35 = vpop.f32.mrb[1].mxu0 }
  0xfd   : > { %v1998_v36 = vadd.f32 %v1997_v35, %v1996_v33  ;;  %v2109_v37 = vpop.f32.mrb[1].mxu1  ;;  %v1999_v38 = vpop.f32.mrb[2].mxu0 }
  0xfe   : > { %v2110_v40 = vadd.f32 %v2109_v37, %v2108_v34  ;;  %v2111_v41 = vpop.f32.mrb[2].mxu1  ;;  %v2000_v42 = vpop.f32.mrb[3].mxu0 }
  0xff   : > { %v2001_v43 = vadd.f32 %v2000_v42, %v1999_v38  ;;  %v2112_v44 = vpop.f32.mrb[3].mxu1 }
 0x100   : > { %v1132_v46 = vadd.f32 %v2110_v40, %v1998_v36  ;;  %v2113_v47 = vadd.f32 %v2112_v44, %v2111_v41 }
 0x102   : > { %v1135_v48 = vadd.f32 %v2113_v47, %v2001_v43  ;;  %v1364_v49 = vadd.f32 %v2722_v45, %v1132_v46 }
 0x103   : > { %v2002_v50 = vpop.f32.mrb[4].mxu0 }
 0x104   : > { %v2114_v51 = vpop.f32.mrb[4].mxu1  ;;  %v2003_v52 = vpop.f32.mrb[5].mxu0  ;;  %v2728_v53 = vsel %vm1398_vm0, %v1364_v49, -1e+30  ;;  %v1365_v54 = vadd.f32 %v2722_v45, %v1135_v48 }
 0x105   : > { %v2004_v55 = vadd.f32 %v2003_v52, %v2002_v50  ;;  %v2115_v56 = vpop.f32.mrb[5].mxu1  ;;  %1431 = vmax.xlane.f32.xlu0 %v2728_v53  ;;  %v2005_v57 = vpop.f32.mrb[6].mxu0 }
 0x106   : > { %v2116_v58 = vadd.f32 %v2115_v56, %v2114_v51  ;;  %v2117_v59 = vpop.f32.mrb[6].mxu1  ;;  %v2006_v60 = vpop.f32.mrb[7].mxu0  ;;  %v2734_v1 = vsel %vm1398_vm0, %v1365_v54, -1e+30 }
 0x107   : > { %v2007_v61 = vadd.f32 %v2006_v60, %v2005_v57  ;;  %v2118_v62 = vpop.f32.mrb[7].mxu1 }
 0x108   : > { %v1140_v63 = vadd.f32 %v2116_v58, %v2004_v55  ;;  %v2119_v0 = vadd.f32 %v2118_v62, %v2117_v59 }
 0x109   : > { %1433 = vmax.xlane.f32.xlu0 %v2734_v1 }
 0x10a   : > { %v1143_v2 = vadd.f32 %v2119_v0, %v2007_v61  ;;  %v1366_v3 = vadd.f32 %v2722_v45, %v1140_v63 }
 0x10b   : > { %v2008_v4 = vpop.f32.mrb[8].mxu0 }
 0x10c   : > { %v2120_v5 = vpop.f32.mrb[8].mxu1  ;;  %v2009_v6 = vpop.f32.mrb[9].mxu0  ;;  %v2740_v7 = vsel %vm1398_vm0, %v1366_v3, -1e+30  ;;  %v1367_v8 = vadd.f32 %v2722_v45, %v1143_v2 }
 0x10d   : > { %v2010_v9 = vadd.f32 %v2009_v6, %v2008_v4  ;;  %v2121_v10 = vpop.f32.mrb[9].mxu1  ;;  %1435 = vmax.xlane.f32.xlu1 %v2740_v7  ;;  %v2011_v11 = vpop.f32.mrb[10].mxu0 }
 0x10e   : > { %v2122_v12 = vadd.f32 %v2121_v10, %v2120_v5  ;;  %v2123_v13 = vpop.f32.mrb[10].mxu1  ;;  %v2012_v14 = vpop.f32.mrb[11].mxu0  ;;  %v2746_v19 = vsel %vm1398_vm0, %v1367_v8, -1e+30 }
 0x10f   : > { %v2013_v15 = vadd.f32 %v2012_v14, %v2011_v11  ;;  %v2124_v16 = vpop.f32.mrb[11].mxu1 }
 0x110   : > { %v1148_v17 = vadd.f32 %v2122_v12, %v2010_v9  ;;  %v2125_v18 = vadd.f32 %v2124_v16, %v2123_v13 }
 0x111   : > { %1437 = vmax.xlane.f32.xlu1 %v2746_v19 }
 0x112   : > { %v1151_v20 = vadd.f32 %v2125_v18, %v2013_v15  ;;  %v1368_v21 = vadd.f32 %v2722_v45, %v1148_v17 }
 0x113   : > { %v2014_v22 = vpop.f32.mrb[12].mxu0 }
 0x114   : > { %v2126_v23 = vpop.f32.mrb[12].mxu1  ;;  %v2015_v24 = vpop.f32.mrb[13].mxu0  ;;  %v2752_v25 = vsel %vm1398_vm0, %v1368_v21, -1e+30  ;;  %v1369_v26 = vadd.f32 %v2722_v45, %v1151_v20 }
 0x115   : > { %v2016_v27 = vadd.f32 %v2015_v24, %v2014_v22  ;;  %v2127_v28 = vpop.f32.mrb[13].mxu1  ;;  %1439 = vmax.xlane.f32.xlu0 %v2752_v25  ;;  %v2017_v29 = vpop.f32.mrb[14].mxu0 }
 0x116   : > { %v2128_v30 = vadd.f32 %v2127_v28, %v2126_v23  ;;  %v2129_v31 = vpop.f32.mrb[14].mxu1  ;;  %v2018_v32 = vpop.f32.mrb[15].mxu0  ;;  %v2758_v33 = vsel %vm1398_vm0, %v1369_v26, -1e+30 }
 0x117   : > { %v2019_v34 = vadd.f32 %v2018_v32, %v2017_v29  ;;  %v2130_v35 = vpop.f32.mrb[15].mxu1  ;;  %1441 = vmax.xlane.f32.xlu1 %v2758_v33 }
 0x118   : > { %v1156_v36 = vadd.f32 %v2128_v30, %v2016_v27  ;;  %v2131_v37 = vadd.f32 %v2130_v35, %v2129_v31 }
 0x11a   : > { %v1159_v38 = vadd.f32 %v2131_v37, %v2019_v34  ;;  %v1370_v40 = vadd.f32 %v2722_v45, %v1156_v36 }
 0x11b   : > { %v2020_v41 = vpop.f32.mrb[16].mxu0 }
 0x11c   : > { %v2132_v42 = vpop.f32.mrb[16].mxu1  ;;  %v2021_v43 = vpop.f32.mrb[17].mxu0  ;;  %v2764_v44 = vsel %vm1398_vm0, %v1370_v40, -1e+30  ;;  %v1371_v46 = vadd.f32 %v2722_v45, %v1159_v38 }
 0x11d   : > { %v2022_v47 = vadd.f32 %v2021_v43, %v2020_v41  ;;  %v2133_v48 = vpop.f32.mrb[17].mxu1  ;;  %1443 = vmax.xlane.f32.xlu0 %v2764_v44  ;;  %v2023_v49 = vpop.f32.mrb[18].mxu0 }
 0x11e   : > { %v2134_v50 = vadd.f32 %v2133_v48, %v2132_v42  ;;  %v2135_v51 = vpop.f32.mrb[18].mxu1  ;;  %v2024_v52 = vpop.f32.mrb[19].mxu0  ;;  %v2770_v54 = vsel %vm1398_vm0, %v1371_v46, -1e+30 }
 0x11f   : > { %v2025_v55 = vadd.f32 %v2024_v52, %v2023_v49  ;;  %v2136_v56 = vpop.f32.mrb[19].mxu1  ;;  %1445 = vmax.xlane.f32.xlu1 %v2770_v54 }
 0x120   : > { %v1164_v57 = vadd.f32 %v2134_v50, %v2022_v47  ;;  %v2137_v58 = vadd.f32 %v2136_v56, %v2135_v51 }
 0x122   : > { %v1167_v59 = vadd.f32 %v2137_v58, %v2025_v55  ;;  %v1372_v60 = vadd.f32 %v2722_v45, %v1164_v57 }
 0x123   : > { %v2026_v61 = vpop.f32.mrb[20].mxu0 }
 0x124   : > { %v2138_v62 = vpop.f32.mrb[20].mxu1  ;;  %v2027_v63 = vpop.f32.mrb[21].mxu0  ;;  %v2776_v0 = vsel %vm1398_vm0, %v1372_v60, -1e+30  ;;  %v1373_v2 = vadd.f32 %v2722_v45, %v1167_v59 }
 0x125   : > { %v2028_v3 = vadd.f32 %v2027_v63, %v2026_v61  ;;  %v2139_v4 = vpop.f32.mrb[21].mxu1  ;;  %1447 = vmax.xlane.f32.xlu0 %v2776_v0  ;;  %v2029_v5 = vpop.f32.mrb[22].mxu0 }
 0x126   : > { %v2140_v6 = vadd.f32 %v2139_v4, %v2138_v62  ;;  %v2141_v8 = vpop.f32.mrb[22].mxu1  ;;  %v2030_v9 = vpop.f32.mrb[23].mxu0  ;;  %v2782_v10 = vsel %vm1398_vm0, %v1373_v2, -1e+30 }
 0x127   : > { %v2031_v11 = vadd.f32 %v2030_v9, %v2029_v5  ;;  %v2142_v12 = vpop.f32.mrb[23].mxu1  ;;  %1449 = vmax.xlane.f32.xlu1 %v2782_v10 }
 0x128   : > { %v1172_v13 = vadd.f32 %v2140_v6, %v2028_v3  ;;  %v2143_v14 = vadd.f32 %v2142_v12, %v2141_v8 }
 0x12a   : > { %v1175_v15 = vadd.f32 %v2143_v14, %v2031_v11  ;;  %v1374_v16 = vadd.f32 %v2722_v45, %v1172_v13 }
 0x12b   : > { %v2032_v17 = vpop.f32.mrb[24].mxu0 }
 0x12c   : > { %v2144_v18 = vpop.f32.mrb[24].mxu1  ;;  %v2033_v20 = vpop.f32.mrb[25].mxu0  ;;  %v2788_v21 = vsel %vm1398_vm0, %v1374_v16, -1e+30  ;;  %v1375_v22 = vadd.f32 %v2722_v45, %v1175_v15 }
 0x12d   : > { %v2034_v23 = vadd.f32 %v2033_v20, %v2032_v17  ;;  %v2145_v24 = vpop.f32.mrb[25].mxu1  ;;  %1451 = vmax.xlane.f32.xlu0 %v2788_v21  ;;  %v2035_v26 = vpop.f32.mrb[26].mxu0 }
 0x12e   : > { %v2146_v27 = vadd.f32 %v2145_v24, %v2144_v18  ;;  %v2147_v28 = vpop.f32.mrb[26].mxu1  ;;  %v2036_v29 = vpop.f32.mrb[27].mxu0  ;;  %v2794_v30 = vsel %vm1398_vm0, %v1375_v22, -1e+30 }
 0x12f   : > { %v2037_v31 = vadd.f32 %v2036_v29, %v2035_v26  ;;  %v2148_v32 = vpop.f32.mrb[27].mxu1  ;;  %1453 = vmax.xlane.f32.xlu1 %v2794_v30 }
 0x130   : > { %v1180_v34 = vadd.f32 %v2146_v27, %v2034_v23  ;;  %v2149_v35 = vadd.f32 %v2148_v32, %v2147_v28 }
 0x132   : > { %v1183_v36 = vadd.f32 %v2149_v35, %v2037_v31  ;;  %v1376_v37 = vadd.f32 %v2722_v45, %v1180_v34 }
 0x133   : > { %v2038_v38 = vpop.f32.mrb[28].mxu0 }
 0x134   : > { %v2150_v40 = vpop.f32.mrb[28].mxu1  ;;  %v2039_v41 = vpop.f32.mrb[29].mxu0  ;;  %v2800_v42 = vsel %vm1398_vm0, %v1376_v37, -1e+30  ;;  %v1377_v43 = vadd.f32 %v2722_v45, %v1183_v36 }
 0x135   : > { %v2040_v46 = vadd.f32 %v2039_v41, %v2038_v38  ;;  %v2151_v47 = vpop.f32.mrb[29].mxu1  ;;  %1455 = vmax.xlane.f32.xlu0 %v2800_v42  ;;  %v2041_v48 = vpop.f32.mrb[30].mxu0 }
 0x136   : > { %v2152_v49 = vadd.f32 %v2151_v47, %v2150_v40  ;;  %v2153_v50 = vpop.f32.mrb[30].mxu1  ;;  %v2042_v51 = vpop.f32.mrb[31].mxu0  ;;  %v2806_v52 = vsel %vm1398_vm0, %v1377_v43, -1e+30 }
 0x137   : > { %v2043_v55 = vadd.f32 %v2042_v51, %v2041_v48  ;;  %v2154_v56 = vpop.f32.mrb[31].mxu1  ;;  %1457 = vmax.xlane.f32.xlu1 %v2806_v52 }
 0x138   : > { %v1188_v57 = vadd.f32 %v2152_v49, %v2040_v46  ;;  %v2155_v58 = vadd.f32 %v2154_v56, %v2153_v50 }
 0x13a   : > { %v1191_v59 = vadd.f32 %v2155_v58, %v2043_v55  ;;  %v1378_v60 = vadd.f32 %v2722_v45, %v1188_v57 }
 0x13b   : > { %v2044_v61 = vpop.f32.mrb[32].mxu0 }
 0x13c   : > { %v2156_v62 = vpop.f32.mrb[32].mxu1  ;;  %v2045_v63 = vpop.f32.mrb[33].mxu0  ;;  %v2812_v2 = vsel %vm1398_vm0, %v1378_v60, -1e+30  ;;  %v1379_v3 = vadd.f32 %v2722_v45, %v1191_v59 }
 0x13d   : > { %v2046_v4 = vadd.f32 %v2045_v63, %v2044_v61  ;;  %v2157_v5 = vpop.f32.mrb[33].mxu1  ;;  %1459 = vmax.xlane.f32.xlu0 %v2812_v2  ;;  %v2047_v6 = vpop.f32.mrb[34].mxu0 }
 0x13e   : > { %v2158_v8 = vadd.f32 %v2157_v5, %v2156_v62  ;;  %v2159_v9 = vpop.f32.mrb[34].mxu1  ;;  %v2048_v11 = vpop.f32.mrb[35].mxu0  ;;  %v2818_v12 = vsel %vm1398_vm0, %v1379_v3, -1e+30 }
 0x13f   : > { %v2049_v13 = vadd.f32 %v2048_v11, %v2047_v6  ;;  %v2160_v14 = vpop.f32.mrb[35].mxu1  ;;  %1461 = vmax.xlane.f32.xlu1 %v2818_v12 }
 0x140   : > { %v1196_v15 = vadd.f32 %v2158_v8, %v2046_v4  ;;  %v2161_v16 = vadd.f32 %v2160_v14, %v2159_v9 }
 0x142   : > { %v1199_v17 = vadd.f32 %v2161_v16, %v2049_v13  ;;  %v1380_v18 = vadd.f32 %v2722_v45, %v1196_v15 }
 0x143   : > { %v2050_v20 = vpop.f32.mrb[36].mxu0 }
 0x144   : > { %v2162_v22 = vpop.f32.mrb[36].mxu1  ;;  %v2051_v23 = vpop.f32.mrb[37].mxu0  ;;  %v2824_v24 = vsel %vm1398_vm0, %v1380_v18, -1e+30  ;;  %v1381_v26 = vadd.f32 %v2722_v45, %v1199_v17 }
 0x145   : > { %v2052_v27 = vadd.f32 %v2051_v23, %v2050_v20  ;;  %v2163_v28 = vpop.f32.mrb[37].mxu1  ;;  %1463 = vmax.xlane.f32.xlu0 %v2824_v24  ;;  %v2053_v29 = vpop.f32.mrb[38].mxu0 }
 0x146   : > { %v2164_v31 = vadd.f32 %v2163_v28, %v2162_v22  ;;  %v2165_v32 = vpop.f32.mrb[38].mxu1  ;;  %v2054_v34 = vpop.f32.mrb[39].mxu0  ;;  %v2830_v35 = vsel %vm1398_vm0, %v1381_v26, -1e+30 }
 0x147   : > { %v2055_v36 = vadd.f32 %v2054_v34, %v2053_v29  ;;  %v2166_v37 = vpop.f32.mrb[39].mxu1  ;;  %1465 = vmax.xlane.f32.xlu1 %v2830_v35 }
 0x148   : > { %v1204_v38 = vadd.f32 %v2164_v31, %v2052_v27  ;;  %v2167_v40 = vadd.f32 %v2166_v37, %v2165_v32 }
 0x14a   : > { %v1207_v41 = vadd.f32 %v2167_v40, %v2055_v36  ;;  %v1382_v43 = vadd.f32 %v2722_v45, %v1204_v38 }
 0x14b   : > { %v2056_v46 = vpop.f32.mrb[40].mxu0 }
 0x14c   : > { %v2168_v47 = vpop.f32.mrb[40].mxu1  ;;  %v2057_v48 = vpop.f32.mrb[41].mxu0  ;;  %v2836_v49 = vsel %vm1398_vm0, %v1382_v43, -1e+30  ;;  %v1383_v50 = vadd.f32 %v2722_v45, %v1207_v41 }
 0x14d   : > { %v2058_v51 = vadd.f32 %v2057_v48, %v2056_v46  ;;  %v2169_v55 = vpop.f32.mrb[41].mxu1  ;;  %1467 = vmax.xlane.f32.xlu0 %v2836_v49  ;;  %v2059_v56 = vpop.f32.mrb[42].mxu0 }
 0x14e   : > { %v2170_v57 = vadd.f32 %v2169_v55, %v2168_v47  ;;  %v2171_v58 = vpop.f32.mrb[42].mxu1  ;;  %v2060_v59 = vpop.f32.mrb[43].mxu0  ;;  %v2842_v60 = vsel %vm1398_vm0, %v1383_v50, -1e+30 }
 0x14f   : > { %v2061_v61 = vadd.f32 %v2060_v59, %v2059_v56  ;;  %v2172_v62 = vpop.f32.mrb[43].mxu1  ;;  %1469 = vmax.xlane.f32.xlu1 %v2842_v60 }
 0x150   : > { %v1212_v63 = vadd.f32 %v2170_v57, %v2058_v51  ;;  %v2173_v3 = vadd.f32 %v2172_v62, %v2171_v58 }
 0x152   : > { %v1215_v4 = vadd.f32 %v2173_v3, %v2061_v61  ;;  %v1384_v5 = vadd.f32 %v2722_v45, %v1212_v63 }
 0x153   : > { %v2062_v6 = vpop.f32.mrb[44].mxu0 }
 0x154   : > { %v2174_v8 = vpop.f32.mrb[44].mxu1  ;;  %v2063_v9 = vpop.f32.mrb[45].mxu0  ;;  %v2848_v11 = vsel %vm1398_vm0, %v1384_v5, -1e+30  ;;  %v1385_v13 = vadd.f32 %v2722_v45, %v1215_v4 }
 0x155   : > { %v2064_v14 = vadd.f32 %v2063_v9, %v2062_v6  ;;  %v2175_v15 = vpop.f32.mrb[45].mxu1  ;;  %1471 = vmax.xlane.f32.xlu0 %v2848_v11  ;;  %v2065_v16 = vpop.f32.mrb[46].mxu0 }
 0x156   : > { %v2176_v17 = vadd.f32 %v2175_v15, %v2174_v8  ;;  %v2177_v18 = vpop.f32.mrb[46].mxu1  ;;  %v2066_v20 = vpop.f32.mrb[47].mxu0  ;;  %v2854_v22 = vsel %vm1398_vm0, %v1385_v13, -1e+30 }
 0x157   : > { %v2067_v23 = vadd.f32 %v2066_v20, %v2065_v16  ;;  %v2178_v26 = vpop.f32.mrb[47].mxu1  ;;  %1473 = vmax.xlane.f32.xlu1 %v2854_v22 }
 0x158   : > { %v1220_v27 = vadd.f32 %v2176_v17, %v2064_v14  ;;  %v2179_v28 = vadd.f32 %v2178_v26, %v2177_v18 }
 0x15a   : > { %v1223_v29 = vadd.f32 %v2179_v28, %v2067_v23  ;;  %v1386_v31 = vadd.f32 %v2722_v45, %v1220_v27 }
 0x15b   : > { %v2068_v32 = vpop.f32.mrb[48].mxu0 }
 0x15c   : > { %v2180_v34 = vpop.f32.mrb[48].mxu1  ;;  %v2069_v36 = vpop.f32.mrb[49].mxu0  ;;  %v2860_v37 = vsel %vm1398_vm0, %v1386_v31, -1e+30  ;;  %v1387_v38 = vadd.f32 %v2722_v45, %v1223_v29 }
 0x15d   : > { %v2070_v40 = vadd.f32 %v2069_v36, %v2068_v32  ;;  %v2181_v41 = vpop.f32.mrb[49].mxu1  ;;  %1475 = vmax.xlane.f32.xlu0 %v2860_v37  ;;  %v2071_v43 = vpop.f32.mrb[50].mxu0 }
 0x15e   : > { %v2182_v46 = vadd.f32 %v2181_v41, %v2180_v34  ;;  %v2183_v47 = vpop.f32.mrb[50].mxu1  ;;  %v2072_v48 = vpop.f32.mrb[51].mxu0  ;;  %v2866_v50 = vsel %vm1398_vm0, %v1387_v38, -1e+30 }
 0x15f   : > { %v2073_v51 = vadd.f32 %v2072_v48, %v2071_v43  ;;  %v2184_v55 = vpop.f32.mrb[51].mxu1  ;;  %1477 = vmax.xlane.f32.xlu1 %v2866_v50 }
 0x160   : > { %v1228_v56 = vadd.f32 %v2182_v46, %v2070_v40  ;;  %v2185_v57 = vadd.f32 %v2184_v55, %v2183_v47 }
 0x162   : > { %v1231_v58 = vadd.f32 %v2185_v57, %v2073_v51  ;;  %v1388_v59 = vadd.f32 %v2722_v45, %v1228_v56 }
 0x163   : > { %v2074_v61 = vpop.f32.mrb[52].mxu0 }
 0x164   : > { %v2186_v62 = vpop.f32.mrb[52].mxu1  ;;  %v2075_v63 = vpop.f32.mrb[53].mxu0  ;;  %v2872_v3 = vsel %vm1398_vm0, %v1388_v59, -1e+30  ;;  %v1389_v4 = vadd.f32 %v2722_v45, %v1231_v58 }
 0x165   : > { %v2076_v5 = vadd.f32 %v2075_v63, %v2074_v61  ;;  %v2187_v6 = vpop.f32.mrb[53].mxu1  ;;  %1479 = vmax.xlane.f32.xlu0 %v2872_v3  ;;  %v2077_v8 = vpop.f32.mrb[54].mxu0 }
 0x166   : > { %v2188_v9 = vadd.f32 %v2187_v6, %v2186_v62  ;;  %v2189_v13 = vpop.f32.mrb[54].mxu1  ;;  %v2078_v14 = vpop.f32.mrb[55].mxu0  ;;  %v2878_v15 = vsel %vm1398_vm0, %v1389_v4, -1e+30 }
 0x167   : > { %v2079_v16 = vadd.f32 %v2078_v14, %v2077_v8  ;;  %v2190_v17 = vpop.f32.mrb[55].mxu1  ;;  %1481 = vmax.xlane.f32.xlu1 %v2878_v15 }
 0x168   : > { %v1236_v18 = vadd.f32 %v2188_v9, %v2076_v5  ;;  %v2191_v20 = vadd.f32 %v2190_v17, %v2189_v13 }
 0x16a   : > { %v1239_v23 = vadd.f32 %v2191_v20, %v2079_v16  ;;  %v1390_v26 = vadd.f32 %v2722_v45, %v1236_v18 }
 0x16b   : > { %v2080_v27 = vpop.f32.mrb[56].mxu0 }
 0x16c   : > { %v2192_v28 = vpop.f32.mrb[56].mxu1  ;;  %v2081_v29 = vpop.f32.mrb[57].mxu0  ;;  %v2884_v31 = vsel %vm1398_vm0, %v1390_v26, -1e+30  ;;  %v1391_v32 = vadd.f32 %v2722_v45, %v1239_v23 }
 0x16d   : > { %v2082_v34 = vadd.f32 %v2081_v29, %v2080_v27  ;;  %v2193_v36 = vpop.f32.mrb[57].mxu1  ;;  %1483 = vmax.xlane.f32.xlu0 %v2884_v31  ;;  %v2083_v38 = vpop.f32.mrb[58].mxu0 }
 0x16e   : > { %v2194_v40 = vadd.f32 %v2193_v36, %v2192_v28  ;;  %v2195_v41 = vpop.f32.mrb[58].mxu1  ;;  %v2084_v43 = vpop.f32.mrb[59].mxu0  ;;  %v2890_v46 = vsel %vm1398_vm0, %v1391_v32, -1e+30 }
 0x16f   : > { %v2085_v47 = vadd.f32 %v2084_v43, %v2083_v38  ;;  %v2196_v48 = vpop.f32.mrb[59].mxu1  ;;  %1485 = vmax.xlane.f32.xlu1 %v2890_v46 }
 0x170   : > { %v1244_v51 = vadd.f32 %v2194_v40, %v2082_v34  ;;  %v2197_v55 = vadd.f32 %v2196_v48, %v2195_v41 }
 0x172   : > { %v1247_v56 = vadd.f32 %v2197_v55, %v2085_v47  ;;  %v1392_v57 = vadd.f32 %v2722_v45, %v1244_v51 }
 0x173   : > { %v2086_v58 = vpop.f32.mrb[60].mxu0 }
 0x174   : > { %v2198_v59 = vpop.f32.mrb[60].mxu1  ;;  %v2087_v61 = vpop.f32.mrb[61].mxu0  ;;  %v2896_v62 = vsel %vm1398_vm0, %v1392_v57, -1e+30  ;;  %v1393_v63 = vadd.f32 %v2722_v45, %v1247_v56 }
 0x175   : > { %v2088_v4 = vadd.f32 %v2087_v61, %v2086_v58  ;;  %v2199_v5 = vpop.f32.mrb[61].mxu1  ;;  %1487 = vmax.xlane.f32.xlu0 %v2896_v62  ;;  %v2089_v6 = vpop.f32.mrb[62].mxu0 }
 0x176   : > { %v2200_v8 = vadd.f32 %v2199_v5, %v2198_v59  ;;  %v2201_v9 = vpop.f32.mrb[62].mxu1  ;;  %v2090_v13 = vpop.f32.mrb[63].mxu0  ;;  %v2902_v14 = vsel %vm1398_vm0, %v1393_v63, -1e+30 }
 0x177   : > { %v2091_v16 = vadd.f32 %v2090_v13, %v2089_v6  ;;  %v2202_v17 = vpop.f32.mrb[63].mxu1  ;;  %1489 = vmax.xlane.f32.xlu1 %v2902_v14 }
 0x178   : > { %v1252_v18 = vadd.f32 %v2200_v8, %v2088_v4  ;;  %v2203_v20 = vadd.f32 %v2202_v17, %v2201_v9 }
 0x17a   : > { %v1255_v23 = vadd.f32 %v2203_v20, %v2091_v16  ;;  %v1394_v26 = vadd.f32 %v2722_v45, %v1252_v18 }
 0x17c   : > { %v2908_v27 = vsel %vm1398_vm0, %v1394_v26, -1e+30  ;;  %v1395_v28 = vadd.f32 %v2722_v45, %v1255_v23 }
 0x17d   : > { %1491 = vmax.xlane.f32.xlu0 %v2908_v27 }
 0x17e   : > { %v2914_v29 = vsel %vm1398_vm0, %v1395_v28, -1e+30 }
 0x17f   : > { %1493 = vmax.xlane.f32.xlu1 %v2914_v29 }
 0x192   : > { %v1432_v32 = vpop.xlane.xlu0 %1431 }
 0x193   : > { %v2918_v34 = vsub.f32 %v2728_v53, %v1432_v32 }
 0x195   : > { %v1527_v36 = vmul.f32 1.442695, %v2918_v34 }
 0x196   : > { %v1434_v38 = vpop.xlane.xlu0 %1433 }
 0x197   : > { %2356 = vpow2.f32 %v1527_v36  ;;  %v2922_v40 = vsub.f32 %v2734_v1, %v1434_v38 }
 0x199   : > { %v1529_v45 = vmul.f32 1.442695, %v2922_v40 }
 0x19a   : > { %v1436_v41 = vpop.xlane.xlu1 %1435 }
 0x19b   : > { %2358 = vpow2.f32 %v1529_v45  ;;  %v2926_v39 = vsub.f32 %v2740_v7, %v1436_v41 }
 0x19d   : > { %v1531_v43 = vmul.f32 1.442695, %v2926_v39 }
 0x19e   : > { %v1438_v47 = vpop.xlane.xlu1 %1437 }
 0x19f   : > { %2360 = vpow2.f32 %v1531_v43  ;;  %v2930_v53 = vsub.f32 %v2746_v19, %v1438_v47 }
 0x1a1   : > { %v2357_v48 = vpop.eup %2356  ;;  %v1533_v51 = vmul.f32 1.442695, %v2930_v53 }
 0x1a2   : > { %1591 = vadd.xlane.f32.xlu0 %v2357_v48  ;;  %v1440_v1 = vpop.xlane.xlu0 %1439 }
 0x1a3   : > { %2362 = vpow2.f32 %v1533_v51  ;;  %v2934_v55 = vsub.f32 %v2752_v25, %v1440_v1 }
 0x1a4   : > { %v1442_v56 = vpop.xlane.xlu1 %1441 }
 0x1a5   : > { %v2359_v57 = vpop.eup %2358  ;;  %v1535_v7 = vmul.f32 1.442695, %v2934_v55  ;;  %v2938_v58 = vsub.f32 %v2758_v33, %v1442_v56 }
 0x1a6   : > { %1593 = vadd.xlane.f32.xlu1 %v2359_v57 }
 0x1a7   : > { %2364 = vpow2.f32 %v1535_v7  ;;  %v1537_v19 = vmul.f32 1.442695, %v2938_v58 }
 0x1a9   : > { %v2361_v59 = vpop.eup %2360  ;;  %2366 = vpow2.f32 %v1537_v19 }
 0x1aa   : > { %1595 = vadd.xlane.f32.xlu0 %v2361_v59  ;;  %v1444_v61 = vpop.xlane.xlu0 %1443 }
 0x1ab   : > { %v2942_v63 = vsub.f32 %v2764_v44, %v1444_v61 }
 0x1ac   : > { %v1446_v25 = vpop.xlane.xlu1 %1445 }
 0x1ad   : > { %v2363_v4 = vpop.eup %2362  ;;  %v1539_v5 = vmul.f32 1.442695, %v2942_v63  ;;  %v2946_v6 = vsub.f32 %v2770_v54, %v1446_v25 }
 0x1ae   : > { %1597 = vadd.xlane.f32.xlu1 %v2363_v4 }
 0x1af   : > { %2368 = vpow2.f32 %v1539_v5  ;;  %v1541_v33 = vmul.f32 1.442695, %v2946_v6 }
 0x1b1   : > { %v2365_v8 = vpop.eup %2364  ;;  %2370 = vpow2.f32 %v1541_v33 }
 0x1b2   : > { %1599 = vadd.xlane.f32.xlu0 %v2365_v8  ;;  %v1448_v9 = vpop.xlane.xlu0 %1447 }
 0x1b3   : > { %v2367_v13 = vpop.eup %2366  ;;  %v2950_v16 = vsub.f32 %v2776_v0, %v1448_v9 }
 0x1b4   : > { %v1450_v44 = vpop.xlane.xlu1 %1449  ;;  %1601 = vadd.xlane.f32.xlu1 %v2367_v13 }
 0x1b5   : > { %v1543_v17 = vmul.f32 1.442695, %v2950_v16  ;;  %v2954_v18 = vsub.f32 %v2782_v10, %v1450_v44 }
 0x1b7   : > { %2372 = vpow2.f32 %v1543_v17  ;;  %v1545_v54 = vmul.f32 1.442695, %v2954_v18 }
 0x1b9   : > { %v2369_v20 = vpop.eup %2368  ;;  %2374 = vpow2.f32 %v1545_v54 }
 0x1ba   : > { %1603 = vadd.xlane.f32.xlu0 %v2369_v20  ;;  %v1452_v23 = vpop.xlane.xlu0 %1451 }
 0x1bb   : > { %v2371_v26 = vpop.eup %2370  ;;  %v2958_v28 = vsub.f32 %v2788_v21, %v1452_v23 }
 0x1bc   : > { %v1454_v0 = vpop.xlane.xlu1 %1453  ;;  %1605 = vadd.xlane.f32.xlu1 %v2371_v26 }
 0x1bd   : > { %v1547_v32 = vmul.f32 1.442695, %v2958_v28  ;;  %v2962_v36 = vsub.f32 %v2794_v30, %v1454_v0 }
 0x1bf   : > { %2376 = vpow2.f32 %v1547_v32  ;;  %v1549_v10 = vmul.f32 1.442695, %v2962_v36 }
 0x1c1   : > { %v2373_v38 = vpop.eup %2372  ;;  %2378 = vpow2.f32 %v1549_v10 }
 0x1c2   : > { %1607 = vadd.xlane.f32.xlu0 %v2373_v38  ;;  %v1456_v45 = vpop.xlane.xlu0 %1455 }
 0x1c3   : > { %v2375_v41 = vpop.eup %2374  ;;  %v2966_v43 = vsub.f32 %v2800_v42, %v1456_v45 }
 0x1c4   : > { %v1458_v21 = vpop.xlane.xlu1 %1457  ;;  %1609 = vadd.xlane.f32.xlu1 %v2375_v41 }
 0x1c5   : > { %v1551_v47 = vmul.f32 1.442695, %v2966_v43  ;;  %v2970_v48 = vsub.f32 %v2806_v52, %v1458_v21 }
 0x1c7   : > { %2380 = vpow2.f32 %v1551_v47  ;;  %v1553_v30 = vmul.f32 1.442695, %v2970_v48 }
 0x1c9   : > { %v2377_v51 = vpop.eup %2376  ;;  %2382 = vpow2.f32 %v1553_v30 }
 0x1ca   : > { %1611 = vadd.xlane.f32.xlu0 %v2377_v51  ;;  %v1460_v1 = vpop.xlane.xlu0 %1459 }
 0x1cb   : > { %v2379_v56 = vpop.eup %2378  ;;  %v2974_v57 = vsub.f32 %v2812_v2, %v1460_v1 }
 0x1cc   : > { %v1462_v42 = vpop.xlane.xlu1 %1461  ;;  %1613 = vadd.xlane.f32.xlu1 %v2379_v56 }
 0x1cd   : > { %v1555_v7 = vmul.f32 1.442695, %v2974_v57  ;;  %v2978_v19 = vsub.f32 %v2818_v12, %v1462_v42 }
 0x1cf   : > { %2384 = vpow2.f32 %v1555_v7  ;;  %v1557_v52 = vmul.f32 1.442695, %v2978_v19 }
 0x1d1   : > { %v2381_v59 = vpop.eup %2380  ;;  %2386 = vpow2.f32 %v1557_v52 }
 0x1d2   : > { %1615 = vadd.xlane.f32.xlu0 %v2381_v59  ;;  %v1464_v61 = vpop.xlane.xlu0 %1463 }
 0x1d3   : > { %v2383_v25 = vpop.eup %2382  ;;  %v2982_v4 = vsub.f32 %v2824_v24, %v1464_v61 }
 0x1d4   : > { %v1466_v2 = vpop.xlane.xlu1 %1465  ;;  %1617 = vadd.xlane.f32.xlu1 %v2383_v25 }
 0x1d5   : > { %v1559_v5 = vmul.f32 1.442695, %v2982_v4  ;;  %v2986_v33 = vsub.f32 %v2830_v35, %v1466_v2 }
 0x1d7   : > { %2388 = vpow2.f32 %v1559_v5  ;;  %v1561_v12 = vmul.f32 1.442695, %v2986_v33 }
 0x1d9   : > { %v2385_v8 = vpop.eup %2384  ;;  %2390 = vpow2.f32 %v1561_v12 }
 0x1da   : > { %1619 = vadd.xlane.f32.xlu0 %v2385_v8  ;;  %v1468_v9 = vpop.xlane.xlu0 %1467 }
 0x1db   : > { %v2387_v13 = vpop.eup %2386  ;;  %v2990_v44 = vsub.f32 %v2836_v49, %v1468_v9 }
 0x1dc   : > { %v1470_v24 = vpop.xlane.xlu1 %1469  ;;  %1621 = vadd.xlane.f32.xlu1 %v2387_v13 }
 0x1dd   : > { %v1563_v17 = vmul.f32 1.442695, %v2990_v44  ;;  %v2994_v54 = vsub.f32 %v2842_v60, %v1470_v24 }
 0x1df   : > { %2392 = vpow2.f32 %v1563_v17  ;;  %v1565_v35 = vmul.f32 1.442695, %v2994_v54 }
 0x1e1   : > { %v2389_v20 = vpop.eup %2388  ;;  %2394 = vpow2.f32 %v1565_v35 }
 0x1e2   : > { %1623 = vadd.xlane.f32.xlu0 %v2389_v20  ;;  %v1472_v23 = vpop.xlane.xlu0 %1471 }
 0x1e3   : > { %v2391_v26 = vpop.eup %2390  ;;  %v2998_v0 = vsub.f32 %v2848_v11, %v1472_v23 }
 0x1e4   : > { %v1474_v49 = vpop.xlane.xlu1 %1473  ;;  %1625 = vadd.xlane.f32.xlu1 %v2391_v26 }
 0x1e5   : > { %v1567_v32 = vmul.f32 1.442695, %v2998_v0  ;;  %v3002_v10 = vsub.f32 %v2854_v22, %v1474_v49 }
 0x1e7   : > { %2396 = vpow2.f32 %v1567_v32  ;;  %v1569_v60 = vmul.f32 1.442695, %v3002_v10 }
 0x1e9   : > { %v2393_v38 = vpop.eup %2392  ;;  %2398 = vpow2.f32 %v1569_v60 }
 0x1ea   : > { %1627 = vadd.xlane.f32.xlu0 %v2393_v38  ;;  %v1476_v45 = vpop.xlane.xlu0 %1475 }
 0x1eb   : > { %v2395_v41 = vpop.eup %2394  ;;  %v3006_v21 = vsub.f32 %v2860_v37, %v1476_v45 }
 0x1ec   : > { %v1478_v11 = vpop.xlane.xlu1 %1477  ;;  %1629 = vadd.xlane.f32.xlu1 %v2395_v41 }
 0x1ed   : > { %v1571_v47 = vmul.f32 1.442695, %v3006_v21  ;;  %v3010_v30 = vsub.f32 %v2866_v50, %v1478_v11 }
 0x1ef   : > { %2400 = vpow2.f32 %v1571_v47  ;;  %v1573_v22 = vmul.f32 1.442695, %v3010_v30 }
 0x1f1   : > { %v2397_v51 = vpop.eup %2396  ;;  %2402 = vpow2.f32 %v1573_v22 }
 0x1f2   : > { %1631 = vadd.xlane.f32.xlu0 %v2397_v51  ;;  %v1480_v1 = vpop.xlane.xlu0 %1479 }
 0x1f3   : > { %v2399_v56 = vpop.eup %2398  ;;  %v3014_v42 = vsub.f32 %v2872_v3, %v1480_v1 }
 0x1f4   : > { %v1482_v37 = vpop.xlane.xlu1 %1481  ;;  %1633 = vadd.xlane.f32.xlu1 %v2399_v56 }
 0x1f5   : > { %v1575_v7 = vmul.f32 1.442695, %v3014_v42  ;;  %v3018_v52 = vsub.f32 %v2878_v15, %v1482_v37 }
 0x1f7   : > { %2404 = vpow2.f32 %v1575_v7  ;;  %v1577_v50 = vmul.f32 1.442695, %v3018_v52 }
 0x1f9   : > { %v2401_v59 = vpop.eup %2400  ;;  %2406 = vpow2.f32 %v1577_v50 }
 0x1fa   : > { %1635 = vadd.xlane.f32.xlu0 %v2401_v59  ;;  %v1484_v61 = vpop.xlane.xlu0 %1483 }
 0x1fb   : > { %v2403_v25 = vpop.eup %2402  ;;  %v3022_v2 = vsub.f32 %v2884_v31, %v1484_v61 }
 0x1fc   : > { %v1486_v3 = vpop.xlane.xlu1 %1485  ;;  %1637 = vadd.xlane.f32.xlu1 %v2403_v25 }
 0x1fd   : > { %v1579_v5 = vmul.f32 1.442695, %v3022_v2  ;;  %v3026_v12 = vsub.f32 %v2890_v46, %v1486_v3 }
 0x1ff   : > { %2408 = vpow2.f32 %v1579_v5  ;;  %v1581_v15 = vmul.f32 1.442695, %v3026_v12 }
 0x201   : > { %v2405_v8 = vpop.eup %2404  ;;  %2410 = vpow2.f32 %v1581_v15 }
 0x202   : > { %1639 = vadd.xlane.f32.xlu0 %v2405_v8  ;;  %v1488_v9 = vpop.xlane.xlu0 %1487 }
 0x203   : > { %v2407_v13 = vpop.eup %2406  ;;  %v3030_v24 = vsub.f32 %v2896_v62, %v1488_v9 }
 0x204   : > { %v1490_v31 = vpop.xlane.xlu1 %1489  ;;  %1641 = vadd.xlane.f32.xlu1 %v2407_v13 }
 0x205   : > { %v1583_v17 = vmul.f32 1.442695, %v3030_v24  ;;  %v3034_v35 = vsub.f32 %v2902_v14, %v1490_v31 }
 0x207   : > { %2412 = vpow2.f32 %v1583_v17  ;;  %v1585_v46 = vmul.f32 1.442695, %v3034_v35 }
 0x209   : > { %v2409_v20 = vpop.eup %2408  ;;  %2414 = vpow2.f32 %v1585_v46 }
 0x20a   : > { %1643 = vadd.xlane.f32.xlu0 %v2409_v20  ;;  %v1492_v23 = vpop.xlane.xlu0 %1491 }
 0x20b   : > { %v2411_v26 = vpop.eup %2410  ;;  %v3038_v49 = vsub.f32 %v2908_v27, %v1492_v23 }
 0x20c   : > { %v1494_v62 = vpop.xlane.xlu1 %1493  ;;  %1645 = vadd.xlane.f32.xlu1 %v2411_v26 }
 0x20d   : > { %v1587_v32 = vmul.f32 1.442695, %v3038_v49  ;;  %v3042_v60 = vsub.f32 %v2914_v29, %v1494_v62 }
 0x20f   : > { %2416 = vpow2.f32 %v1587_v32  ;;  %v1589_v14 = vmul.f32 1.442695, %v3042_v60 }
 0x211   : > { %v2413_v38 = vpop.eup %2412  ;;  %2418 = vpow2.f32 %v1589_v14 }
 0x212   : > { %1647 = vadd.xlane.f32.xlu0 %v2413_v38 }
 0x213   : > { %v2415_v45 = vpop.eup %2414 }
 0x214   : > { %1649 = vadd.xlane.f32.xlu1 %v2415_v45 }
 0x219   : > { %v2417_v41 = vpop.eup %2416 }
 0x21a   : > { %1651 = vadd.xlane.f32.xlu0 %v2417_v41 }
 0x21b   : > { %v2419_v27 = vpop.eup %2418 }
 0x21c   : > { %1653 = vadd.xlane.f32.xlu1 %v2419_v27 }
 0x22f   : > { %v1592_v11 = vpop.xlane.xlu0 %1591 }
 0x230   : > { %2420 = vlog2.f32 %v1592_v11 }
 0x233   : > { %v1594_v47 = vpop.xlane.xlu1 %1593 }
 0x234   : > { %2422 = vlog2.f32 %v1594_v47 }
 0x237   : > { %v1596_v22 = vpop.xlane.xlu0 %1595 }
 0x238   : > { %2424 = vlog2.f32 %v1596_v22 }
 0x23a   : > { %v2421_v29 = vpop.eup %2420 }
 0x23b   : > { %v1656_v51 = vmul.f32 0.6931472, %v2421_v29  ;;  %v1598_v1 = vpop.xlane.xlu1 %1597 }
 0x23c   : > { %2426 = vlog2.f32 %v1598_v1 }
 0x23d   : > { %v1719_v56 = vsub.f32 %v2918_v34, %v1656_v51 }
 0x23e   : > { %v2423_v37 = vpop.eup %2422 }
 0x23f   : > { %1751 = vst [vmem:[%s3049_s20] sm:$0xff] %v1719_v56  ;;  %v1658_v7 = vmul.f32 0.6931472, %v2423_v37  ;;  %v1600_v50 = vpop.xlane.xlu0 %1599 }
 0x240   : > { %2428 = vlog2.f32 %v1600_v50 }
 0x241   : > { %v1720_v59 = vsub.f32 %v2922_v40, %v1658_v7  ;;  %v1602_v61 = vpop.xlane.xlu1 %1601 }
 0x242   : > { %v2425_v25 = vpop.eup %2424  ;;  %2430 = vlog2.f32 %v1602_v61 }
 0x243   : > { %1752 = vst [vmem:[%s3049_s20 + $0x8] sm:$0xff] %v1720_v59  ;;  %v1660_v3 = vmul.f32 0.6931472, %v2425_v25 }
 0x245   : > { %v1721_v5 = vsub.f32 %v2926_v39, %v1660_v3 }
 0x246   : > { %v2427_v15 = vpop.eup %2426 }
 0x247   : > { %1753 = vst [vmem:[%s3049_s20 + $0x10] sm:$0xff] %v1721_v5  ;;  %v1662_v8 = vmul.f32 0.6931472, %v2427_v15  ;;  %v1604_v34 = vpop.xlane.xlu0 %1603 }
 0x248   : > { %2432 = vlog2.f32 %v1604_v34 }
 0x249   : > { %v1722_v9 = vsub.f32 %v2930_v53, %v1662_v8  ;;  %v1606_v13 = vpop.xlane.xlu1 %1605 }
 0x24a   : > { %v2429_v31 = vpop.eup %2428  ;;  %2434 = vlog2.f32 %v1606_v13 }
 0x24b   : > { %1754 = vst [vmem:[%s3049_s20 + $0x18] sm:$0xff] %v1722_v9  ;;  %v1664_v40 = vmul.f32 0.6931472, %v2429_v31 }
 0x24c   : > { %v2431_v17 = vpop.eup %2430 }
 0x24d   : > { %v1723_v46 = vsub.f32 %v2934_v55, %v1664_v40  ;;  %v1666_v20 = vmul.f32 0.6931472, %v2431_v17 }
 0x24f   : > { %1755 = vst [vmem:[%s3049_s20 + $0x20] sm:$0xff] %v1723_v46  ;;  %v1724_v39 = vsub.f32 %v2938_v58, %v1666_v20  ;;  %v1608_v23 = vpop.xlane.xlu0 %1607 }
 0x250   : > { %2436 = vlog2.f32 %v1608_v23 }
 0x251   : > { %1756 = vst [vmem:[%s3049_s20 + $0x28] sm:$0xff] %v1724_v39  ;;  %v1610_v26 = vpop.xlane.xlu1 %1609 }
 0x252   : > { %v2433_v62 = vpop.eup %2432  ;;  %2438 = vlog2.f32 %v1610_v26 }
 0x253   : > { %v1668_v53 = vmul.f32 0.6931472, %v2433_v62 }
 0x254   : > { %v2435_v32 = vpop.eup %2434 }
 0x255   : > { %v1725_v14 = vsub.f32 %v2942_v63, %v1668_v53  ;;  %v1670_v38 = vmul.f32 0.6931472, %v2435_v32 }
 0x257   : > { %1757 = vst [vmem:[%s3049_s20 + $0x30] sm:$0xff] %v1725_v14  ;;  %v1726_v55 = vsub.f32 %v2946_v6, %v1670_v38  ;;  %v1612_v45 = vpop.xlane.xlu0 %1611 }
 0x258   : > { %2440 = vlog2.f32 %v1612_v45 }
 0x259   : > { %1758 = vst [vmem:[%s3049_s20 + $0x38] sm:$0xff] %v1726_v55  ;;  %v1614_v58 = vpop.xlane.xlu1 %1613 }
 0x25a   : > { %v2437_v41 = vpop.eup %2436  ;;  %2442 = vlog2.f32 %v1614_v58 }
 0x25b   : > { %v1672_v27 = vmul.f32 0.6931472, %v2437_v41 }
 0x25c   : > { %v2439_v11 = vpop.eup %2438 }
 0x25d   : > { %v1727_v47 = vsub.f32 %v2950_v16, %v1672_v27  ;;  %v1674_v22 = vmul.f32 0.6931472, %v2439_v11 }
 0x25f   : > { %1759 = vst [vmem:[%s3049_s20 + $0x40] sm:$0xff] %v1727_v47  ;;  %v1728_v63 = vsub.f32 %v2954_v18, %v1674_v22  ;;  %v1616_v29 = vpop.xlane.xlu0 %1615 }
 0x260   : > { %2444 = vlog2.f32 %v1616_v29 }
 0x261   : > { %1760 = vst [vmem:[%s3049_s20 + $0x48] sm:$0xff] %v1728_v63  ;;  %v1618_v6 = vpop.xlane.xlu1 %1617 }
 0x262   : > { %v2441_v51 = vpop.eup %2440  ;;  %2446 = vlog2.f32 %v1618_v6 }
 0x263   : > { %v1676_v1 = vmul.f32 0.6931472, %v2441_v51 }
 0x264   : > { %v2443_v56 = vpop.eup %2442 }
 0x265   : > { %v1729_v37 = vsub.f32 %v2958_v28, %v1676_v1  ;;  %v1678_v7 = vmul.f32 0.6931472, %v2443_v56 }
 0x267   : > { %1761 = vst [vmem:[%s3049_s20 + $0x50] sm:$0xff] %v1729_v37  ;;  %v1730_v16 = vsub.f32 %v2962_v36, %v1678_v7  ;;  %v1620_v50 = vpop.xlane.xlu0 %1619 }
 0x268   : > { %2448 = vlog2.f32 %v1620_v50 }
 0x269   : > { %1762 = vst [vmem:[%s3049_s20 + $0x58] sm:$0xff] %v1730_v16  ;;  %v1622_v18 = vpop.xlane.xlu1 %1621 }
 0x26a   : > { %v2445_v59 = vpop.eup %2444  ;;  %2450 = vlog2.f32 %v1622_v18 }
 0x26b   : > { %v1680_v61 = vmul.f32 0.6931472, %v2445_v59 }
 0x26c   : > { %v2447_v25 = vpop.eup %2446 }
 0x26d   : > { %v1731_v3 = vsub.f32 %v2966_v43, %v1680_v61  ;;  %v1682_v5 = vmul.f32 0.6931472, %v2447_v25 }
 0x26f   : > { %1763 = vst [vmem:[%s3049_s20 + $0x60] sm:$0xff] %v1731_v3  ;;  %v1732_v28 = vsub.f32 %v2970_v48, %v1682_v5  ;;  %v1624_v15 = vpop.xlane.xlu0 %1623 }
 0x270   : > { %2452 = vlog2.f32 %v1624_v15 }
 0x271   : > { %1764 = vst [vmem:[%s3049_s20 + $0x68] sm:$0xff] %v1732_v28  ;;  %v1626_v36 = vpop.xlane.xlu1 %1625 }
 0x272   : > { %v2449_v8 = vpop.eup %2448  ;;  %2454 = vlog2.f32 %v1626_v36 }
 0x273   : > { %v1684_v34 = vmul.f32 0.6931472, %v2449_v8 }
 0x274   : > { %v2451_v9 = vpop.eup %2450 }
 0x275   : > { %v1733_v13 = vsub.f32 %v2974_v57, %v1684_v34  ;;  %v1686_v31 = vmul.f32 0.6931472, %v2451_v9 }
 0x277   : > { %1765 = vst [vmem:[%s3049_s20 + $0x70] sm:$0xff] %v1733_v13  ;;  %v1734_v43 = vsub.f32 %v2978_v19, %v1686_v31  ;;  %v1628_v40 = vpop.xlane.xlu0 %1627 }
 0x278   : > { %2456 = vlog2.f32 %v1628_v40 }
 0x279   : > { %1766 = vst [vmem:[%s3049_s20 + $0x78] sm:$0xff] %v1734_v43  ;;  %v1630_v48 = vpop.xlane.xlu1 %1629 }
 0x27a   : > { %v2453_v17 = vpop.eup %2452  ;;  %2458 = vlog2.f32 %v1630_v48 }
 0x27b   : > { %v1688_v46 = vmul.f32 0.6931472, %v2453_v17 }
 0x27c   : > { %v2455_v20 = vpop.eup %2454 }
 0x27d   : > { %v1735_v39 = vsub.f32 %v2982_v4, %v1688_v46  ;;  %v1690_v23 = vmul.f32 0.6931472, %v2455_v20 }
 0x27f   : > { %1767 = vst [vmem:[%s3049_s20 + $0x80] sm:$0xff] %v1735_v39  ;;  %v1736_v57 = vsub.f32 %v2986_v33, %v1690_v23  ;;  %v1632_v26 = vpop.xlane.xlu0 %1631 }
 0x280   : > { %2460 = vlog2.f32 %v1632_v26 }
 0x281   : > { %1768 = vst [vmem:[%s3049_s20 + $0x88] sm:$0xff] %v1736_v57  ;;  %v1634_v19 = vpop.xlane.xlu1 %1633 }
 0x282   : > { %v2457_v62 = vpop.eup %2456  ;;  %2462 = vlog2.f32 %v1634_v19 }
 0x283   : > { %v1692_v53 = vmul.f32 0.6931472, %v2457_v62 }
 0x284   : > { %v2459_v32 = vpop.eup %2458 }
 0x285   : > { %v1737_v14 = vsub.f32 %v2990_v44, %v1692_v53  ;;  %v1694_v38 = vmul.f32 0.6931472, %v2459_v32 }
 0x287   : > { %1769 = vst [vmem:[%s3049_s20 + $0x90] sm:$0xff] %v1737_v14  ;;  %v1738_v4 = vsub.f32 %v2994_v54, %v1694_v38  ;;  %v1636_v55 = vpop.xlane.xlu0 %1635 }
 0x288   : > { %2464 = vlog2.f32 %v1636_v55 }
 0x289   : > { %1770 = vst [vmem:[%s3049_s20 + $0x98] sm:$0xff] %v1738_v4  ;;  %v1638_v33 = vpop.xlane.xlu1 %1637 }
 0x28a   : > { %v2461_v45 = vpop.eup %2460  ;;  %2466 = vlog2.f32 %v1638_v33 }
 0x28b   : > { %v1696_v58 = vmul.f32 0.6931472, %v2461_v45 }
 0x28c   : > { %v2463_v41 = vpop.eup %2462 }
 0x28d   : > { %v1739_v27 = vsub.f32 %v2998_v0, %v1696_v58  ;;  %v1698_v11 = vmul.f32 0.6931472, %v2463_v41 }
 0x28f   : > { %1771 = vst [vmem:[%s3049_s20 + $0xa0] sm:$0xff] %v1739_v27  ;;  %v1740_v44 = vsub.f32 %v3002_v10, %v1698_v11  ;;  %v1640_v47 = vpop.xlane.xlu0 %1639 }
 0x290   : > { %2468 = vlog2.f32 %v1640_v47 }
 0x291   : > { %1772 = vst [vmem:[%s3049_s20 + $0xa8] sm:$0xff] %v1740_v44  ;;  %v1642_v54 = vpop.xlane.xlu1 %1641 }
 0x292   : > { %v2465_v22 = vpop.eup %2464  ;;  %2470 = vlog2.f32 %v1642_v54 }
 0x293   : > { %v1700_v63 = vmul.f32 0.6931472, %v2465_v22 }
 0x294   : > { %v2467_v29 = vpop.eup %2466 }
 0x295   : > { %v1741_v6 = vsub.f32 %v3006_v21, %v1700_v63  ;;  %v1702_v51 = vmul.f32 0.6931472, %v2467_v29 }
 0x297   : > { %1773 = vst [vmem:[%s3049_s20 + $0xb0] sm:$0xff] %v1741_v6  ;;  %v1742_v0 = vsub.f32 %v3010_v30, %v1702_v51  ;;  %v1644_v1 = vpop.xlane.xlu0 %1643 }
 0x298   : > { %2472 = vlog2.f32 %v1644_v1 }
 0x299   : > { %1774 = vst [vmem:[%s3049_s20 + $0xb8] sm:$0xff] %v1742_v0  ;;  %v1646_v10 = vpop.xlane.xlu1 %1645 }
 0x29a   : > { %v2469_v56 = vpop.eup %2468  ;;  %2474 = vlog2.f32 %v1646_v10 }
 0x29b   : > { %v1704_v37 = vmul.f32 0.6931472, %v2469_v56 }
 0x29c   : > { %v2471_v7 = vpop.eup %2470 }
 0x29d   : > { %v1743_v16 = vsub.f32 %v3014_v42, %v1704_v37  ;;  %v1706_v50 = vmul.f32 0.6931472, %v2471_v7 }
 0x29f   : > { %1775 = vst [vmem:[%s3049_s20 + $0xc0] sm:$0xff] %v1743_v16  ;;  %v1744_v21 = vsub.f32 %v3018_v52, %v1706_v50  ;;  %v1648_v18 = vpop.xlane.xlu0 %1647 }
 0x2a0   : > { %2476 = vlog2.f32 %v1648_v18 }
 0x2a1   : > { %1776 = vst [vmem:[%s3049_s20 + $0xc8] sm:$0xff] %v1744_v21  ;;  %v1650_v30 = vpop.xlane.xlu1 %1649 }
 0x2a2   : > { %v2473_v59 = vpop.eup %2472  ;;  %2478 = vlog2.f32 %v1650_v30 }
 0x2a3   : > { %v1708_v61 = vmul.f32 0.6931472, %v2473_v59 }
 0x2a4   : > { %v2475_v25 = vpop.eup %2474 }
 0x2a5   : > { %v1745_v3 = vsub.f32 %v3022_v2, %v1708_v61  ;;  %v1710_v5 = vmul.f32 0.6931472, %v2475_v25 }
 0x2a7   : > { %1777 = vst [vmem:[%s3049_s20 + $0xd0] sm:$0xff] %v1745_v3  ;;  %v1746_v42 = vsub.f32 %v3026_v12, %v1710_v5  ;;  %v1652_v28 = vpop.xlane.xlu0 %1651 }
 0x2a8   : > { %2480 = vlog2.f32 %v1652_v28 }
 0x2a9   : > { %1778 = vst [vmem:[%s3049_s20 + $0xd8] sm:$0xff] %v1746_v42  ;;  %v1654_v52 = vpop.xlane.xlu1 %1653 }
 0x2aa   : > { %v2477_v15 = vpop.eup %2476  ;;  %2482 = vlog2.f32 %v1654_v52 }
 0x2ab   : > { %v1712_v36 = vmul.f32 0.6931472, %v2477_v15 }
 0x2ac   : > { %v2479_v8 = vpop.eup %2478 }
 0x2ad   : > { %v1747_v34 = vsub.f32 %v3030_v24, %v1712_v36  ;;  %v1714_v9 = vmul.f32 0.6931472, %v2479_v8 }
 0x2af   : > { %1779 = vst [vmem:[%s3049_s20 + $0xe0] sm:$0xff] %v1747_v34  ;;  %v1748_v2 = vsub.f32 %v3034_v35, %v1714_v9 }
 0x2b1   : > { %1780 = vst [vmem:[%s3049_s20 + $0xe8] sm:$0xff] %v1748_v2 }
 0x2b2   : > { %v2481_v13 = vpop.eup %2480 }
 0x2b3   : > { %v1716_v31 = vmul.f32 0.6931472, %v2481_v13 }
 0x2b4   : > { %v2483_v12 = vpop.eup %2482 }
 0x2b5   : > { %v1749_v43 = vsub.f32 %v3038_v49, %v1716_v31  ;;  %v1718_v40 = vmul.f32 0.6931472, %v2483_v12 }
 0x2b7   : > { %1781 = vst [vmem:[%s3049_s20 + $0xf0] sm:$0xff] %v1749_v43  ;;  %v1750_v48 = vsub.f32 %v3042_v60, %v1718_v40 }
 0x2b9   : > { %1782 = vst [vmem:[%s3049_s20 + $0xf8] sm:$0xff] %v1750_v48 }
 0x2ba PF: > { %s13_s14 = sadd.s32 1, %s2506_s14   ;;  %s3128_s12 = smov %s2502_s13 }
 0x2bb   : > { %p10_p5 = scmp.ge.s32.totalorder %s13_s14, 4   ;;  %s3129_s13 = smov %s3131_s15 }
 0x2bd   :  { %12 = sbr.rel (!%p10_p5) target bundleno = 2 (0x2), region = 73 }

// kernel: gcn_net_forward.2
= control target key start
LH: loop header
LB: loop body
LE: loop exit
PB: predicated region body
PF: predicated region fallthrough
CT: control target
= control target key end

     0   :  { %9 = vsyncpa [#allocation4], 0  ;;  %s3279_s0 = inlined_call_operand.hbm [shape: bf16[512,512], index: 0, kind: input, shape index: {}]   ;;  %s3280_s1 = inlined_call_operand.vmem [shape: bf16[512,128], index: 1, kind: input, shape index: {}]   ;;  %s3281_s2 = inlined_call_operand.vmem [shape: f32[1,128], index: 2, kind: input, shape index: {}]   ;;  %s3282_s3 = inlined_call_operand.vmem [shape: bf16[128,128], index: 3, kind: input, shape index: {}]   ;;  %s3283_s4 = inlined_call_operand.vmem [shape: bf16[512,128], index: 4, kind: output, shape index: {}]  }
   0x1   :  { %11 = vsyncpa [#allocation4 + $0x1], 0  ;;  %s2852_s15 = smov 0   ;;  %s2854_s16 = smov 0  }
   0x2   :  { %s2856_s17 = smov 0   ;;  %s2858_s18 = smov 0  }
   0x3   :  { %s2860_s19 = smov 0   ;;  %s2862_s20 = smov 0  }
   0x4 LB: > { %s1956_s21 = sadd.s32 4294967295, %s2822_s20   ;;  %s29_s22 = sadd.s32 1, %s2818_s19  ;;  %s2822_s20 = sphi %s2862_s20, %s17_s20   ;;  %s2818_s19 = sphi %s2860_s19, %s3291_s19   ;;  %s2814_s18 = sphi %s2858_s18, %s3290_s18   ;;  %s2810_s17 = sphi %s2856_s17, %s3289_s17   ;;  %s2806_s16 = sphi %s2854_s16, %s3288_s16   ;;  %s2802_s15 = sphi %s2852_s15, %s3287_s15  }
   0x5   : > { %p31_p0 = scmp.ge.s32.totalorder %s29_s22, 2  ;;  %s38_s23 = sadd.s32 1, %s2810_s17 }
   0x6   : > { %p45_p1 = scmp.ne.s32.totalorder %s2810_s17, %s2806_s16  ;;  %p46_p2 = scmp.eq.s32.totalorder %s2822_s20, 0 }
   0x7   : > { %s3293_s22 = smov (%p31_p0, %s29_s22), 0  ;;  %p51_p4 = scmp.ne.s32.totalorder %s2806_s16, %s2802_s15 }
   0x8   : > { %p2888_p3 = por %p46_p2, %p45_p1  ;;  %s33_s25 = ssub.s32 %s2818_s19, %s3293_s22 }
   0x9   : > { %p52_p5 = scmp.eq.s32.totalorder %s1956_s21, 0  ;;  %p36_p6 = scmp.eq.s32.totalorder %s33_s25, 0 }
   0xa   : > { %p2555_p8 = scmp.lt.s32.totalorder %s2822_s20, 2  ;;  %s184_s28 = sand.u32 1, %s2810_s17  }
   0xb   : > { %p2895_p7 = por %p52_p5, %p51_p4  ;;  %s2109_s29 = sshll.u32 %s2818_s19, 13 }
   0xc   : > { %s2901_s27 = scalar_select %p36_p6, %s2810_s17, %s38_s23  }
   0xd   : > { %s1961_s30 = sshll.u32 %s184_s28, 9  ;;  %s2908_s7 = scalar_lea.hbm %s3279_s0, %s2109_s29 }
   0xe   : > { %s188_s8 = scalar_lea.vmem [#allocation3], %s1961_s30  ;;  %p2912_p9 = pnand %p2555_p8, %p2888_p3 }
   0xf   : > { %s198_s9 = sshll.u32 %s188_s8, 4  ;;  %s2918_s11 = scalar_lea.sflag [#allocation4], %s184_s28  ;;  %s2916_s9 = int_to_ptr.vmem [resolvable:$true] %s198_s9 }
  0x10   : > { %s2742_s12 = scalar_lea.hbm %s2908_s7, 8192  ;;  %p2744_p11 = pneg %p2912_p9 }
  0x11   : > { %p2743_p10 = scmp.ne.s32.totalorder %s2908_s7, %s2742_s12  ;;  %s2747_s15 = scalar_lea.hbm %s3279_s0, 16384 }
  0x12   : > { %p2748_p0 = scmp.lt.u32.totalorder %s2908_s7, %s3279_s0  ;;  %p2749_p1 = scmp.lt.u32.totalorder %s2747_s15, %s2742_s12 }
  0x13   : > { %p2745_p12 = pnand %p2744_p11, %p2743_p10  ;;  %p2751_p3 = scmp.lt.u32.totalorder %s2742_s12, %s2908_s7 }
  0x14   : > { %p2750_p2 = por %p2749_p1, %p2748_p0 }
  0x15   : > { %p2746_p13 = pneg %p2745_p12 }
  0x16   : > { %p2752_p4 = por %p2751_p3, %p2750_p2 }
  0x18   : > { %p2753_p5 = pnand %p2752_p4, %p2746_p13 }
  0x1a   : > { %2756 = shalt.err (!%p2753_p5)
}
  0x1b   : > { %s2757_s24 = scalar_lea.vmem %s2916_s9, 8192  ;;  %s2824_s25 = smov [#allocation3]  }
  0x1c   : > { %p2758_p6 = scmp.ne.s32.totalorder %s2916_s9, %s2757_s24  ;;  %s2762_s28 = sshll.u32 %s2824_s25, 4  ;;  %s2763_s28 = int_to_ptr.vmem [resolvable:$false] %s2762_s28 }
  0x1d   : > { %s2764_s29 = scalar_lea.vmem %s2763_s28, 16384  ;;  %p2765_p12 = scmp.lt.s32.totalorder %s2916_s9, %s2763_s28 }
  0x1e   : > { %p2760_p8 = pnand %p2758_p6, %p2744_p11  ;;  %p2766_p0 = scmp.lt.s32.totalorder %s2764_s29, %s2757_s24 }
  0x20   : > { %p2761_p10 = pneg %p2760_p8  ;;  %p2767_p1 = por %p2766_p0, %p2765_p12 }
  0x22   : > { %p2768_p2 = pnand %p2767_p1, %p2761_p10 }
  0x24   : > { %2771 = shalt.err (!%p2768_p2)
}
  0x25   : > { %s2825_s30 = smov 256   ;;  %s2826_s5 = smov 16  }
  0x26   : > { %2554 = dma.hbm_to_vmem [thread:$0]  (!%p2912_p9), %s2908_s7, 8192, %s2916_s9, %s2918_s11, %s2825_s30, %s2825_s30, %s2826_s5  }
  0x27   : > { %p1965_p11 = scmp.ge.s32.totalorder %s2822_s20, 1  ;;  %p206_p13 = scmp.lt.s32.totalorder %s2822_s20, 3 }
  0x29   : > { %p207_p3 = pnand %p1965_p11, %p206_p13 }
  0x2a   : > { %s212_s6 = sand.u32 (!%p207_p3), 1, %s2806_s16  }
  0x2b   : > { %210 = sbr.rel (%p207_p3) target bundleno = 679 (0x2a7), region = 36  ;;  %s1966_s8 = sshll.u32 (!%p207_p3), %s212_s6, 9 }
  0x2c   : > { %s213_s12 = scalar_lea.sflag (!%p207_p3), [#allocation4], %s212_s6  ;;  %s2949_s13 = scalar_lea.vmem (!%p207_p3), [#allocation3], %s1966_s8 }
  0x32   : > { %2797 = dma.done.wait (%p2895_p7), %s213_s12, 8192  }
  0x33   : > { %2799 = vsyncadd (%p2895_p7), %s213_s12, 4294959104  ;;  %v2606_v0 = vld [vmem:[%s3280_s1 + $0x40] sm:$0xff]   ;;  %v2608_v2 = vld [vmem:[%s3280_s1 + $0x48] sm:$0xff]   ;;  %s1967_s24 = sshll.u32 %s2814_s18, 5 }
  0x34   : > { %v2607_v1 = vld [vmem:[%s3280_s1] sm:$0xff]   ;;  %2533 = vmatprep.subr.bf16.mxu1 %v2606_v0  ;;  %2237 = vmatprep.subr.bf16.mxu0 %v2606_v0  ;;  %v2609_v3 = vld [vmem:[%s3280_s1 + $0x8] sm:$0xff]   ;;  %v2610_v4 = vld [vmem:[%s3280_s1 + $0x50] sm:$0xff]   ;;  %p255_p7 = scmp.lt.s32.totalorder %s1967_s24, 63 }
  0x35   : > { %2541 = vmatpush3.bf16.msra.mxu1 %v2607_v1  ;;  %2238 = vmatpush3.bf16.msra.mxu0 %v2607_v1  ;;  %v2611_v5 = vld [vmem:[%s3280_s1 + $0x10] sm:$0xff]   ;;  %v2612_v6 = vld [vmem:[%s3280_s1 + $0x58] sm:$0xff]   ;;  %v2614_v8 = vld [vmem:[%s3280_s1 + $0x60] sm:$0xff]  }
  0x36   : > { %2534 = vmatprep.subr.bf16.mxu1 %v2608_v2  ;;  %2239 = vmatprep.subr.bf16.mxu0 %v2608_v2  ;;  %v2613_v7 = vld [vmem:[%s3280_s1 + $0x18] sm:$0xff]   ;;  %v2615_v9 = vld [vmem:[%s3280_s1 + $0x20] sm:$0xff]   ;;  %v2616_v10 = vld [vmem:[%s3280_s1 + $0x68] sm:$0xff]   ;;  %s3295_s24 = smov (!%p255_p7, %s1967_s24), 63 }
  0x37   : > { %v2624_v11 = vld [vmem:[%s2949_s13 + $0x184] ss:$16 sps:$4 sm:$0xff]   ;;  %v2617_v12 = vld [vmem:[%s3280_s1 + $0x28] sm:$0xff]   ;;  %v2620_v15 = vld [vmem:[%s3280_s1 + $0x78] sm:$0xff]   ;;  %s1968_s25 = sshll.u32 %s3295_s24, 2 }
  0x38   : > { %1097 = vmatprep.mubr.bf16.mxu1 %v2624_v11  ;;  %v2618_v13 = vld [vmem:[%s3280_s1 + $0x70] sm:$0xff]   ;;  %v2621_v16 = vld [vmem:[%s3280_s1 + $0x38] sm:$0xff]   ;;  %v2625_v17 = vld [vmem:[%s3280_s1 + $0xc0] sm:$0xff]   ;;  %s3243_s30 = scalar_lea.vmem %s3283_s4, %s1968_s25 }
  0x39   : > { %2542 = vmatpush3.bf16.msra.mxu1 %v2609_v3  ;;  %2240 = vmatpush3.bf16.msra.mxu0 %v2609_v3  ;;  %v2619_v14 = vld [vmem:[%s3280_s1 + $0x30] sm:$0xff]   ;;  %v2626_v19 = vld [vmem:[%s3280_s1 + $0x80] sm:$0xff]   ;;  %v2627_v21 = vld [vmem:[%s3280_s1 + $0xc8] sm:$0xff]  }
  0x3a   : > { %2535 = vmatprep.subr.bf16.mxu1 %v2610_v4  ;;  %2241 = vmatprep.subr.bf16.mxu0 %v2610_v4  ;;  %v2622_v18 = vld [vmem:[%s2949_s13 + $0x180] ss:$16 sps:$4 sm:$0xff]   ;;  %v2629_v20 = vld [vmem:[%s2949_s13 + $0x1a4] ss:$16 sps:$4 sm:$0xff]   ;;  %v2628_v22 = vld [vmem:[%s3280_s1 + $0x88] sm:$0xff]  }
  0x3b   : > { %v2631_v23 = vld [vmem:[%s2949_s13 + $0x1a0] ss:$16 sps:$4 sm:$0xff]   ;;  %v2652_v27 = vld [vmem:[%s2949_s13 + $0x4] ss:$16 sps:$4 sm:$0xff]   ;;  %v2634_v28 = vld [vmem:[%s3280_s1 + $0xd8] sm:$0xff]  }
  0x3c   : > { %v2632_v24 = vld [vmem:[%s3280_s1 + $0xd0] sm:$0xff]   ;;  %1001 = vmatprep.mubr.bf16.mxu0 %v2652_v27  ;;  %v2635_v31 = vld [vmem:[%s3280_s1 + $0x98] sm:$0xff]   ;;  %v2639_v33 = vld [vmem:[%s3280_s1 + $0xe0] sm:$0xff]  }
  0x3d   : > { %2543 = vmatpush3.bf16.msra.mxu1 %v2611_v5  ;;  %2242 = vmatpush3.bf16.msra.mxu0 %v2611_v5  ;;  %v2633_v25 = vld [vmem:[%s3280_s1 + $0x90] sm:$0xff]   ;;  %v2640_v36 = vld [vmem:[%s3280_s1 + $0xa0] sm:$0xff]   ;;  %v2641_v38 = vld [vmem:[%s3280_s1 + $0xe8] sm:$0xff]  }
  0x3e   : > { %2536 = vmatprep.subr.bf16.mxu1 %v2612_v6  ;;  %2243 = vmatprep.subr.bf16.mxu0 %v2612_v6  ;;  %v2650_v26 = vld [vmem:[%s2949_s13] ss:$16 sps:$4 sm:$0xff]   ;;  %v2636_v29 = vld [vmem:[%s2949_s13 + $0x1c4] ss:$16 sps:$4 sm:$0xff]   ;;  %v2642_v39 = vld [vmem:[%s3280_s1 + $0xa8] sm:$0xff]  }
  0x3f   : > { %v2656_v30 = vld [vmem:[%s2949_s13 + $0x24] ss:$16 sps:$4 sm:$0xff]   ;;  %v2638_v32 = vld [vmem:[%s2949_s13 + $0x1c0] ss:$16 sps:$4 sm:$0xff]   ;;  %v2655_v45 = vld [vmem:[%s2949_s13 + $0xc] ss:$16 sps:$4 sm:$0xff]  }
  0x40   : > { %v2660_v34 = vld [vmem:[%s2949_s13 + $0x20] ss:$16 sps:$4 sm:$0xff]   ;;  %v2662_v35 = vld [vmem:[%s2949_s13 + $0x44] ss:$16 sps:$4 sm:$0xff]   ;;  %v2648_v46 = vld [vmem:[%s3280_s1 + $0xf8] sm:$0xff]  }
  0x41   : > { %2544 = vmatpush3.bf16.msra.mxu1 %v2613_v7  ;;  %2244 = vmatpush3.bf16.msra.mxu0 %v2613_v7  ;;  %v2643_v37 = vld [vmem:[%s2949_s13 + $0x1e4] ss:$16 sps:$4 sm:$0xff]   ;;  %v2645_v40 = vld [vmem:[%s2949_s13 + $0x1e0] ss:$16 sps:$4 sm:$0xff]   ;;  %v2649_v47 = vld [vmem:[%s3280_s1 + $0xb8] sm:$0xff]  }
  0x42   : > { %2537 = vmatprep.subr.bf16.mxu1 %v2614_v8  ;;  %2245 = vmatprep.subr.bf16.mxu0 %v2614_v8  ;;  %v2646_v41 = vld [vmem:[%s3280_s1 + $0xf0] sm:$0xff]   ;;  %v2653_v48 = vld [vmem:[%s2949_s13 + $0x8] ss:$16 sps:$4 sm:$0xff]   ;;  %v2658_v51 = vld [vmem:[%s2949_s13 + $0x2c] ss:$16 sps:$4 sm:$0xff]  }
  0x43   : > { %v2666_v42 = vld [vmem:[%s2949_s13 + $0x40] ss:$16 sps:$4 sm:$0xff]   ;;  %v2668_v43 = vld [vmem:[%s2949_s13 + $0x64] ss:$16 sps:$4 sm:$0xff]   ;;  %v2661_v53 = vld [vmem:[%s2949_s13 + $0x28] ss:$16 sps:$4 sm:$0xff]  }
  0x44   : > { %v2647_v44 = vld [vmem:[%s3280_s1 + $0xb0] sm:$0xff]   ;;  %v2664_v55 = vld [vmem:[%s2949_s13 + $0x4c] ss:$16 sps:$4 sm:$0xff]   ;;  %v2667_v57 = vld [vmem:[%s2949_s13 + $0x48] ss:$16 sps:$4 sm:$0xff]  }
  0x45   : > { %2545 = vmatpush3.bf16.msra.mxu1 %v2615_v9  ;;  %2246 = vmatpush3.bf16.msra.mxu0 %v2615_v9  ;;  %v2672_v49 = vld [vmem:[%s2949_s13 + $0x60] ss:$16 sps:$4 sm:$0xff]   ;;  %v2674_v50 = vld [vmem:[%s2949_s13 + $0x84] ss:$16 sps:$4 sm:$0xff]   ;;  %v2670_v59 = vld [vmem:[%s2949_s13 + $0x6c] ss:$16 sps:$4 sm:$0xff]  }
  0x46   : > { %2538 = vmatprep.subr.bf16.mxu1 %v2616_v10  ;;  %2247 = vmatprep.subr.bf16.mxu0 %v2616_v10  ;;  %v2678_v52 = vld [vmem:[%s2949_s13 + $0x80] ss:$16 sps:$4 sm:$0xff]   ;;  %v2680_v54 = vld [vmem:[%s2949_s13 + $0xa4] ss:$16 sps:$4 sm:$0xff]   ;;  %v2673_v61 = vld [vmem:[%s2949_s13 + $0x68] ss:$16 sps:$4 sm:$0xff]  }
  0x47   : > { %v2684_v56 = vld [vmem:[%s2949_s13 + $0xa0] ss:$16 sps:$4 sm:$0xff]   ;;  %v2686_v58 = vld [vmem:[%s2949_s13 + $0xc4] ss:$16 sps:$4 sm:$0xff]   ;;  %v2676_v63 = vld [vmem:[%s2949_s13 + $0x8c] ss:$16 sps:$4 sm:$0xff]  }
  0x48   : > { %v2690_v60 = vld [vmem:[%s2949_s13 + $0xc0] ss:$16 sps:$4 sm:$0xff]   ;;  %v2692_v62 = vld [vmem:[%s2949_s13 + $0xe4] ss:$16 sps:$4 sm:$0xff]   ;;  %v2679_v1 = vld [vmem:[%s2949_s13 + $0x88] ss:$16 sps:$4 sm:$0xff]  }
  0x49   : > { %2546 = vmatpush3.bf16.msra.mxu1 %v2617_v12  ;;  %2248 = vmatpush3.bf16.msra.mxu0 %v2617_v12  ;;  %v2696_v0 = vld [vmem:[%s2949_s13 + $0xe0] ss:$16 sps:$4 sm:$0xff]   ;;  %v2698_v2 = vld [vmem:[%s2949_s13 + $0x104] ss:$16 sps:$4 sm:$0xff]   ;;  %v2682_v3 = vld [vmem:[%s2949_s13 + $0xac] ss:$16 sps:$4 sm:$0xff]  }
  0x4a   : > { %2539 = vmatprep.subr.bf16.mxu1 %v2618_v13  ;;  %2249 = vmatprep.subr.bf16.mxu0 %v2618_v13  ;;  %v2702_v4 = vld [vmem:[%s2949_s13 + $0x100] ss:$16 sps:$4 sm:$0xff]   ;;  %v2685_v5 = vld [vmem:[%s2949_s13 + $0xa8] ss:$16 sps:$4 sm:$0xff]   ;;  %v2704_v6 = vld [vmem:[%s2949_s13 + $0x124] ss:$16 sps:$4 sm:$0xff]  }
  0x4b   : > { %v2688_v7 = vld [vmem:[%s2949_s13 + $0xcc] ss:$16 sps:$4 sm:$0xff]   ;;  %v2708_v8 = vld [vmem:[%s2949_s13 + $0x120] ss:$16 sps:$4 sm:$0xff]   ;;  %v2691_v9 = vld [vmem:[%s2949_s13 + $0xc8] ss:$16 sps:$4 sm:$0xff]  }
  0x4c   : > { %v2710_v10 = vld [vmem:[%s2949_s13 + $0x144] ss:$16 sps:$4 sm:$0xff]   ;;  %v2694_v11 = vld [vmem:[%s2949_s13 + $0xec] ss:$16 sps:$4 sm:$0xff]   ;;  %v2714_v12 = vld [vmem:[%s2949_s13 + $0x140] ss:$16 sps:$4 sm:$0xff]  }
  0x4d   : > { %2547 = vmatpush3.bf16.msra.mxu1 %v2619_v14  ;;  %2250 = vmatpush3.bf16.msra.mxu0 %v2619_v14  ;;  %v2697_v13 = vld [vmem:[%s2949_s13 + $0xe8] ss:$16 sps:$4 sm:$0xff]   ;;  %v2716_v14 = vld [vmem:[%s2949_s13 + $0x164] ss:$16 sps:$4 sm:$0xff]  }
  0x4e   : > { %2540 = vmatprep.subr.bf16.mxu1 %v2620_v15  ;;  %2251 = vmatprep.subr.bf16.mxu0 %v2620_v15  ;;  %v2700_v15 = vld [vmem:[%s2949_s13 + $0x10c] ss:$16 sps:$4 sm:$0xff]   ;;  %v2721_v27 = vld [vmem:[%s2949_s13 + $0x168] ss:$16 sps:$4 sm:$0xff]  }
  0x51   : > { %2548 = vmatpush3.bf16.msra.mxu1 %v2621_v16  ;;  %2252 = vmatpush3.bf16.msra.mxu0 %v2621_v16  ;;  %v2720_v16 = vld [vmem:[%s2949_s13 + $0x160] ss:$16 sps:$4 sm:$0xff]  }
  0x52   : > { %2349 = vmatprep.subr.bf16.mxu1 %v2625_v17  ;;  %v2703_v17 = vld [vmem:[%s2949_s13 + $0x108] ss:$16 sps:$4 sm:$0xff]  }
  0x54   : > { %1098 = vmatmul.mubr.bf16.vlgmr.msra.gmra.mrb[0].mxu1 %v2622_v18  ;;  %1002 = vmatmul.mubr.bf16.vlgmr.msra.gmra.mrb[0].mxu0 %v2650_v26  ;;  %v2706_v18 = vld [vmem:[%s2949_s13 + $0x12c] ss:$16 sps:$4 sm:$0xff]  }
  0x55   : > { %2350 = vmatpush3.bf16.msra.mxu1 %v2626_v19  ;;  %1105 = vmatprep.mubr.bf16.mxu1 %v2629_v20  ;;  %v2734_v19 = vld [vmem:[%s3282_s3] sm:$0xff]   ;;  %v2709_v20 = vld [vmem:[%s2949_s13 + $0x128] ss:$16 sps:$4 sm:$0xff]  }
  0x56   : > { %2351 = vmatprep.subr.bf16.mxu1 %v2627_v21  ;;  %1009 = vmatprep.mubr.bf16.mxu0 %v2656_v30  ;;  %v2712_v21 = vld [vmem:[%s2949_s13 + $0x14c] ss:$16 sps:$4 sm:$0xff]  }
  0x57   : > { %2485 = vmatprep.subr.bf16.mxu0 %v2734_v19  ;;  %v2737_v26 = vld [vmem:[%s3282_s3 + $0x18] sm:$0xff]   ;;  %v2739_v30 = vld [vmem:[%s3282_s3 + $0x28] sm:$0xff]  }
  0x58   : > { %2486 = vmatpush3.bf16.msra.mxu0 %v2734_v19 }
  0x59   : > { %2352 = vmatpush3.bf16.msra.mxu1 %v2628_v22  ;;  %v2735_v22 = vld [vmem:[%s3282_s3 + $0x8] sm:$0xff]  }
  0x5a   : > { %2353 = vmatprep.subr.bf16.mxu1 %v2632_v24  ;;  %v2718_v24 = vld [vmem:[%s2949_s13 + $0x16c] ss:$16 sps:$4 sm:$0xff]   ;;  %2487 = vmatprep.subr.bf16.mxu0 %v2735_v22 }
  0x5c   : > { %1106 = vmatmul.mubr.bf16.gmra.mrb[4].mxu1 %v2631_v23  ;;  %1010 = vmatmul.mubr.bf16.gmra.mrb[4].mxu0 %v2660_v34  ;;  %v2715_v23 = vld [vmem:[%s2949_s13 + $0x148] ss:$16 sps:$4 sm:$0xff]  }
  0x5d   : > { %2354 = vmatpush3.bf16.msra.mxu1 %v2633_v25  ;;  %1113 = vmatprep.mubr.bf16.mxu1 %v2636_v29  ;;  %v2736_v25 = vld [vmem:[%s3282_s3 + $0x10] sm:$0xff]   ;;  %v2738_v29 = vld [vmem:[%s3282_s3 + $0x20] sm:$0xff]   ;;  %v2741_v34 = vld [vmem:[%s3282_s3 + $0x38] sm:$0xff]  }
  0x5e   : > { %2355 = vmatprep.subr.bf16.mxu1 %v2634_v28  ;;  %1017 = vmatprep.mubr.bf16.mxu0 %v2662_v35  ;;  %v2722_v28 = vld [vmem:[%s2949_s13 + $0x18c] ss:$16 sps:$4 sm:$0xff]   ;;  %v2727_v35 = vld [vmem:[%s2949_s13 + $0x1a8] ss:$16 sps:$4 sm:$0xff]  }
  0x5f   : > { %2488 = vmatpush3.bf16.msra.mxu0 %v2735_v22 }
  0x60   : > { %2489 = vmatprep.subr.bf16.mxu0 %v2736_v25 }
  0x61   : > { %2356 = vmatpush3.bf16.msra.mxu1 %v2635_v31  ;;  %v2724_v31 = vld [vmem:[%s2949_s13 + $0x188] ss:$16 sps:$4 sm:$0xff]  }
  0x62   : > { %2357 = vmatprep.subr.bf16.mxu1 %v2639_v33  ;;  %v2740_v33 = vld [vmem:[%s3282_s3 + $0x30] sm:$0xff]  }
  0x63   : > { %2490 = vmatpush3.bf16.msra.mxu0 %v2736_v25 }
  0x64   : > { %1114 = vmatmul.mubr.bf16.gmra.mrb[8].mxu1 %v2638_v32  ;;  %1018 = vmatmul.mubr.bf16.gmra.mrb[8].mxu0 %v2666_v42  ;;  %v2725_v32 = vld [vmem:[%s2949_s13 + $0x1ac] ss:$16 sps:$4 sm:$0xff]  }
  0x65   : > { %2358 = vmatpush3.bf16.msra.mxu1 %v2640_v36  ;;  %1121 = vmatprep.mubr.bf16.mxu1 %v2643_v37  ;;  %v2728_v36 = vld [vmem:[%s2949_s13 + $0x1cc] ss:$16 sps:$4 sm:$0xff]   ;;  %v2730_v37 = vld [vmem:[%s2949_s13 + $0x1c8] ss:$16 sps:$4 sm:$0xff]  }
  0x66   : > { %2359 = vmatprep.subr.bf16.mxu1 %v2641_v38  ;;  %1025 = vmatprep.mubr.bf16.mxu0 %v2668_v43  ;;  %v2731_v38 = vld [vmem:[%s2949_s13 + $0x1ec] ss:$16 sps:$4 sm:$0xff]  }
  0x67   : > { %2491 = vmatprep.subr.bf16.mxu0 %v2737_v26 }
  0x68   : > { %2492 = vmatpush3.bf16.msra.mxu0 %v2737_v26 }
  0x69   : > { %2360 = vmatpush3.bf16.msra.mxu1 %v2642_v39  ;;  %2493 = vmatprep.subr.bf16.mxu0 %v2738_v29  ;;  %v2733_v39 = vld [vmem:[%s2949_s13 + $0x1e8] ss:$16 sps:$4 sm:$0xff]  }
  0x6a   : > { %2361 = vmatprep.subr.bf16.mxu1 %v2646_v41 }
  0x6c   : > { %1122 = vmatmul.mubr.bf16.gmra.mrb[12].mxu1 %v2645_v40  ;;  %1026 = vmatmul.mubr.bf16.gmra.mrb[12].mxu0 %v2672_v49 }
  0x6d   : > { %2362 = vmatpush3.bf16.msra.mxu1 %v2647_v44  ;;  %1162 = vmatprep.mubr.bf16.mxu1 %v2655_v45 }
  0x6e   : > { %2363 = vmatprep.subr.bf16.mxu1 %v2648_v46  ;;  %1033 = vmatprep.mubr.bf16.mxu0 %v2674_v50 }
  0x6f   : > { %2494 = vmatpush3.bf16.msra.mxu0 %v2738_v29 }
  0x70   : > { %2495 = vmatprep.subr.bf16.mxu0 %v2739_v30 }
  0x71   : > { %2364 = vmatpush3.bf16.msra.mxu1 %v2649_v47 }
  0x73   : > { %2496 = vmatpush3.bf16.msra.mxu0 %v2739_v30 }
  0x74   : > { %1163 = vmatmul.mubr.bf16.vlgmr.msra.gmra.mrb[16].mxu1 %v2653_v48  ;;  %1034 = vmatmul.mubr.bf16.gmra.mrb[16].mxu0 %v2678_v52 }
  0x75   : > { %1170 = vmatprep.mubr.bf16.mxu1 %v2658_v51  ;;  %1041 = vmatprep.mubr.bf16.mxu0 %v2680_v54 }
  0x76   : > { %2497 = vmatprep.subr.bf16.mxu0 %v2740_v33 }
  0x77   : > { %2498 = vmatpush3.bf16.msra.mxu0 %v2740_v33 }
  0x78   : > { %2499 = vmatprep.subr.bf16.mxu0 %v2741_v34 }
  0x7b   : > { %2500 = vmatpush3.bf16.msra.mxu0 %v2741_v34 }
  0x7c   : > { %1171 = vmatmul.mubr.bf16.gmra.mrb[20].mxu1 %v2661_v53  ;;  %1042 = vmatmul.mubr.bf16.gmra.mrb[20].mxu0 %v2684_v56 }
  0x7d   : > { %1178 = vmatprep.mubr.bf16.mxu1 %v2664_v55  ;;  %1049 = vmatprep.mubr.bf16.mxu0 %v2686_v58 }
  0x84   : > { %1179 = vmatmul.mubr.bf16.gmra.mrb[24].mxu1 %v2667_v57  ;;  %1050 = vmatmul.mubr.bf16.gmra.mrb[24].mxu0 %v2690_v60 }
  0x85   : > { %1186 = vmatprep.mubr.bf16.mxu1 %v2670_v59  ;;  %1057 = vmatprep.mubr.bf16.mxu0 %v2692_v62 }
  0x8c   : > { %1187 = vmatmul.mubr.bf16.gmra.mrb[28].mxu1 %v2673_v61  ;;  %1058 = vmatmul.mubr.bf16.gmra.mrb[28].mxu0 %v2696_v0 }
  0x8d   : > { %1194 = vmatprep.mubr.bf16.mxu1 %v2676_v63  ;;  %1065 = vmatprep.mubr.bf16.mxu0 %v2698_v2 }
  0x94   : > { %1195 = vmatmul.mubr.bf16.gmra.mrb[32].mxu1 %v2679_v1  ;;  %1066 = vmatmul.mubr.bf16.gmra.mrb[32].mxu0 %v2702_v4 }
  0x95   : > { %1202 = vmatprep.mubr.bf16.mxu1 %v2682_v3  ;;  %1073 = vmatprep.mubr.bf16.mxu0 %v2704_v6 }
  0x9c   : > { %1203 = vmatmul.mubr.bf16.gmra.mrb[36].mxu1 %v2685_v5  ;;  %1074 = vmatmul.mubr.bf16.gmra.mrb[36].mxu0 %v2708_v8 }
  0x9d   : > { %1210 = vmatprep.mubr.bf16.mxu1 %v2688_v7  ;;  %1081 = vmatprep.mubr.bf16.mxu0 %v2710_v10 }
  0xa4   : > { %1211 = vmatmul.mubr.bf16.gmra.mrb[40].mxu1 %v2691_v9  ;;  %1082 = vmatmul.mubr.bf16.gmra.mrb[40].mxu0 %v2714_v12 }
  0xa5   : > { %1218 = vmatprep.mubr.bf16.mxu1 %v2694_v11  ;;  %1089 = vmatprep.mubr.bf16.mxu0 %v2716_v14 }
  0xac   : > { %1219 = vmatmul.mubr.bf16.gmra.mrb[44].mxu1 %v2697_v13  ;;  %1090 = vmatmul.mubr.bf16.gmra.mrb[44].mxu0 %v2720_v16 }
  0xad   : > { %1226 = vmatprep.mubr.bf16.mxu1 %v2700_v15 }
  0xb4   : > { %1227 = vmatmul.mubr.bf16.gmra.mrb[48].mxu1 %v2703_v17 }
  0xb5   : > { %1234 = vmatprep.mubr.bf16.mxu1 %v2706_v18 }
  0xbc   : > { %1235 = vmatmul.mubr.bf16.gmra.mrb[52].mxu1 %v2709_v20 }
  0xbd   : > { %1242 = vmatprep.mubr.bf16.mxu1 %v2712_v21 }
  0xc4   : > { %1243 = vmatmul.mubr.bf16.gmra.mrb[56].mxu1 %v2715_v23 }
  0xc5   : > { %1250 = vmatprep.mubr.bf16.mxu1 %v2718_v24 }
  0xcc   : > { %1251 = vmatmul.mubr.bf16.gmra.mrb[60].mxu1 %v2721_v27  ;;  %v3160_v27 = vld [vmem:[%s3281_s2] ss:$0 sm:$0xff] }
  0xcd   : > { %1258 = vmatprep.mubr.bf16.mxu1 %v2722_v28 }
  0xd4   : > { %1259 = vmatmul.mubr.bf16.gmra.mrb[64].mxu1 %v2724_v31 }
  0xd5   : > { %1266 = vmatprep.mubr.bf16.mxu1 %v2725_v32 }
  0xdc   : > { %1267 = vmatmul.mubr.bf16.gmra.mrb[68].mxu1 %v2727_v35 }
  0xdd   : > { %1274 = vmatprep.mubr.bf16.mxu1 %v2728_v36 }
  0xe4   : > { %1275 = vmatmul.mubr.bf16.gmra.mrb[72].mxu1 %v2730_v37 }
  0xe5   : > { %1282 = vmatprep.mubr.bf16.mxu1 %v2731_v38 }
  0xec   : > { %1283 = vmatmul.mubr.bf16.gmra.mrb[76].mxu1 %v2733_v39 }
 0x127   : > { %v2325_v40 = vpop.f32.mrb[0].mxu1  ;;  %v2253_v46 = vpop.f32.mrb[0].mxu0 }
 0x128   : > { %v2326_v41 = vpop.f32.mrb[1].mxu1  ;;  %v2254_v48 = vpop.f32.mrb[1].mxu0 }
 0x129   : > { %v3139_v42 = vadd.f32 %v2326_v41, %v2325_v40  ;;  %v2328_v43 = vpop.f32.mrb[2].mxu1  ;;  %v2255_v50 = vadd.f32 %v2254_v48, %v2253_v46  ;;  %v2256_v51 = vpop.f32.mrb[2].mxu0 }
 0x12a   : > { %v2329_v44 = vpop.f32.mrb[3].mxu1  ;;  %v2257_v54 = vpop.f32.mrb[3].mxu0 }
 0x12b   : > { %v3141_v45 = vadd.f32 %v2329_v44, %v2328_v43  ;;  %v2258_v56 = vadd.f32 %v2257_v54, %v2256_v51 }
 0x12f   : > { %v2331_v47 = vpop.f32.mrb[4].mxu1  ;;  %v2259_v58 = vpop.f32.mrb[4].mxu0 }
 0x130   : > { %v2332_v49 = vpop.f32.mrb[5].mxu1  ;;  %v2260_v60 = vpop.f32.mrb[5].mxu0 }
 0x131   : > { %v3143_v52 = vadd.f32 %v2332_v49, %v2331_v47  ;;  %v2334_v53 = vpop.f32.mrb[6].mxu1  ;;  %v2261_v62 = vadd.f32 %v2260_v60, %v2259_v58  ;;  %v2262_v63 = vpop.f32.mrb[6].mxu0 }
 0x132   : > { %v2335_v55 = vpop.f32.mrb[7].mxu1  ;;  %v2263_v2 = vpop.f32.mrb[7].mxu0 }
 0x133   : > { %v3145_v57 = vadd.f32 %v2335_v55, %v2334_v53  ;;  %v2264_v4 = vadd.f32 %v2263_v2, %v2262_v63 }
 0x137   : > { %v2337_v59 = vpop.f32.mrb[8].mxu1  ;;  %v2265_v6 = vpop.f32.mrb[8].mxu0 }
 0x138   : > { %v2338_v61 = vpop.f32.mrb[9].mxu1  ;;  %v2266_v8 = vpop.f32.mrb[9].mxu0 }
 0x139   : > { %v3147_v0 = vadd.f32 %v2338_v61, %v2337_v59  ;;  %v2340_v1 = vpop.f32.mrb[10].mxu1  ;;  %v2267_v10 = vadd.f32 %v2266_v8, %v2265_v6  ;;  %v2268_v11 = vpop.f32.mrb[10].mxu0 }
 0x13a   : > { %v2341_v3 = vpop.f32.mrb[11].mxu1  ;;  %v2269_v14 = vpop.f32.mrb[11].mxu0 }
 0x13b   : > { %v3149_v5 = vadd.f32 %v2341_v3, %v2340_v1  ;;  %v2270_v16 = vadd.f32 %v2269_v14, %v2268_v11 }
 0x13f   : > { %v2343_v7 = vpop.f32.mrb[12].mxu1  ;;  %v2271_v18 = vpop.f32.mrb[12].mxu0 }
 0x140   : > { %v2344_v9 = vpop.f32.mrb[13].mxu1  ;;  %v2272_v20 = vpop.f32.mrb[13].mxu0 }
 0x141   : > { %v3151_v12 = vadd.f32 %v2344_v9, %v2343_v7  ;;  %v2346_v13 = vpop.f32.mrb[14].mxu1  ;;  %v3155_v22 = vadd.f32 %v2272_v20, %v2271_v18  ;;  %v2274_v23 = vpop.f32.mrb[14].mxu0 }
 0x142   : > { %v2347_v15 = vpop.f32.mrb[15].mxu1  ;;  %v2275_v26 = vpop.f32.mrb[15].mxu0 }
 0x143   : > { %v3153_v17 = vadd.f32 %v2347_v15, %v2346_v13  ;;  %v3162_v29 = vadd.f32 %v2275_v26, %v2274_v23 }
 0x147   : > { %v2365_v19 = vpop.f32.mrb[16].mxu1  ;;  %v2277_v34 = vpop.f32.mrb[16].mxu0 }
 0x148   : > { %v2366_v21 = vpop.f32.mrb[17].mxu1  ;;  %v2278_v37 = vpop.f32.mrb[17].mxu0 }
 0x149   : > { %v2367_v24 = vadd.f32 %v2366_v21, %v2365_v19  ;;  %v2368_v25 = vpop.f32.mrb[18].mxu1  ;;  %v3166_v39 = vadd.f32 %v2278_v37, %v2277_v34  ;;  %v2280_v40 = vpop.f32.mrb[18].mxu0 }
 0x14a   : > { %v2369_v28 = vpop.f32.mrb[19].mxu1  ;;  %v2281_v47 = vpop.f32.mrb[19].mxu0 }
 0x14b   : > { %v1165_v30 = vadd.f32 %v2367_v24, %v2255_v50  ;;  %v2370_v31 = vadd.f32 %v2369_v28, %v2368_v25  ;;  %v3168_v49 = vadd.f32 %v2281_v47, %v2280_v40 }
 0x14d   : > { %v1397_v32 = vadd.f32 %v3160_v27, %v1165_v30  ;;  %v1168_v33 = vadd.f32 %v2370_v31, %v2258_v56 }
 0x14f   : > { %v1398_v35 = vadd.f32 %v3160_v27, %v1168_v33  ;;  %v2371_v36 = vpop.f32.mrb[20].mxu1  ;;  %v1429_v41 = vmax.f32 %v1397_v32, 0.0  ;;  %v2283_v56 = vpop.f32.mrb[20].mxu0 }
 0x150   : > { %v2372_v38 = vpop.f32.mrb[21].mxu1  ;;  %v2284_v60 = vpop.f32.mrb[21].mxu0 }
 0x151   : > { %v1430_v43 = vmax.f32 %v1398_v35, 0.0  ;;  %v2373_v44 = vadd.f32 %v2372_v38, %v2371_v36  ;;  %v2374_v46 = vpop.f32.mrb[22].mxu1  ;;  %v3172_v63 = vadd.f32 %v2284_v60, %v2283_v56  ;;  %v2286_v1 = vpop.f32.mrb[22].mxu0 }
 0x152   : > { %v2375_v48 = vpop.f32.mrb[23].mxu1 }
 0x153   : > { %v1173_v50 = vadd.f32 %v2373_v44, %v2261_v62  ;;  %v2376_v51 = vadd.f32 %v2375_v48, %v2374_v46  ;;  %v1461_v53 = vpack.c.bf16 %v1430_v43, %v1429_v41  ;;  %v2287_v62 = vpop.f32.mrb[23].mxu0 }
 0x154   : > { %v3174_v9 = vadd.f32 %v2287_v62, %v2286_v1 }
 0x155   : > { %v1399_v54 = vadd.f32 %v3160_v27, %v1173_v50  ;;  %v1176_v55 = vadd.f32 %v2376_v51, %v2264_v4  ;;  %2501 = vmatprep.mubr.bf16.mxu0 %v1461_v53 }
 0x157   : > { %v1400_v58 = vadd.f32 %v3160_v27, %v1176_v55  ;;  %v2377_v59 = vpop.f32.mrb[24].mxu1  ;;  %v1431_v2 = vmax.f32 %v1399_v54, 0.0  ;;  %v2289_v18 = vpop.f32.mrb[24].mxu0 }
 0x158   : > { %v2378_v61 = vpop.f32.mrb[25].mxu1  ;;  %v2290_v21 = vpop.f32.mrb[25].mxu0 }
 0x159   : > { %v1432_v3 = vmax.f32 %v1400_v58, 0.0  ;;  %v2379_v6 = vadd.f32 %v2378_v61, %v2377_v59  ;;  %v2380_v7 = vpop.f32.mrb[26].mxu1  ;;  %v3178_v24 = vadd.f32 %v2290_v21, %v2289_v18  ;;  %v2292_v25 = vpop.f32.mrb[26].mxu0 }
 0x15a   : > { %v2381_v8 = vpop.f32.mrb[27].mxu1  ;;  %v2293_v32 = vpop.f32.mrb[27].mxu0 }
 0x15b   : > { %v1462_v11 = vpack.c.bf16 %v1432_v3, %v1431_v2  ;;  %v1181_v4 = vadd.f32 %v2379_v6, %v2267_v10  ;;  %v2382_v13 = vadd.f32 %v2381_v8, %v2380_v7  ;;  %v3180_v33 = vadd.f32 %v2293_v32, %v2292_v25 }
 0x15d   : > { %v1401_v14 = vadd.f32 %v3160_v27, %v1181_v4  ;;  %v1184_v15 = vadd.f32 %v2382_v13, %v2270_v16  ;;  %2502 = vmatmul.mubr.bf16.vlgmr.msra.gmra.mrb[48].mxu0 %v1462_v11 }
 0x15f   : > { %v1402_v19 = vadd.f32 %v3160_v27, %v1184_v15  ;;  %v2383_v20 = vpop.f32.mrb[28].mxu1  ;;  %v1433_v26 = vmax.f32 %v1401_v14, 0.0  ;;  %v2295_v38 = vpop.f32.mrb[28].mxu0 }
 0x160   : > { %v2384_v23 = vpop.f32.mrb[29].mxu1  ;;  %v2296_v43 = vpop.f32.mrb[29].mxu0 }
 0x161   : > { %v1434_v28 = vmax.f32 %v1402_v19, 0.0  ;;  %v2385_v30 = vadd.f32 %v2384_v23, %v2383_v20  ;;  %v2386_v31 = vpop.f32.mrb[30].mxu1  ;;  %v3186_v46 = vadd.f32 %v2296_v43, %v2295_v38  ;;  %v2298_v47 = vpop.f32.mrb[30].mxu0 }
 0x162   : > { %v2387_v10 = vpop.f32.mrb[31].mxu1  ;;  %v2299_v53 = vpop.f32.mrb[31].mxu0 }
 0x163   : > { %v1189_v16 = vadd.f32 %v2385_v30, %v3155_v22  ;;  %v2388_v34 = vadd.f32 %v2387_v10, %v2386_v31  ;;  %v1463_v35 = vpack.c.bf16 %v1434_v28, %v1433_v26  ;;  %v3188_v55 = vadd.f32 %v2299_v53, %v2298_v47 }
 0x165   : > { %v1403_v36 = vadd.f32 %v3160_v27, %v1189_v16  ;;  %v1192_v37 = vadd.f32 %v2388_v34, %v3162_v29  ;;  %2505 = vmatprep.mubr.bf16.mxu0 %v1463_v35 }
 0x167   : > { %v1404_v40 = vadd.f32 %v3160_v27, %v1192_v37  ;;  %v2389_v41 = vpop.f32.mrb[32].mxu1  ;;  %v1435_v48 = vmax.f32 %v1403_v36, 0.0  ;;  %v2301_v61 = vpop.f32.mrb[32].mxu0 }
 0x168   : > { %v2390_v44 = vpop.f32.mrb[33].mxu1  ;;  %v2302_v3 = vpop.f32.mrb[33].mxu0 }
 0x169   : > { %v1436_v50 = vmax.f32 %v1404_v40, 0.0  ;;  %v2391_v51 = vadd.f32 %v2390_v44, %v2389_v41  ;;  %v2392_v22 = vpop.f32.mrb[34].mxu1  ;;  %v3194_v7 = vadd.f32 %v2302_v3, %v2301_v61  ;;  %v2304_v62 = vpop.f32.mrb[34].mxu0 }
 0x16a   : > { %v2393_v54 = vpop.f32.mrb[35].mxu1  ;;  %v2305_v13 = vpop.f32.mrb[35].mxu0 }
 0x16b   : > { %v1197_v29 = vadd.f32 %v2391_v51, %v3166_v39  ;;  %v2394_v56 = vadd.f32 %v2393_v54, %v2392_v22  ;;  %v1464_v58 = vpack.c.bf16 %v1436_v50, %v1435_v48  ;;  %v3196_v15 = vadd.f32 %v2305_v13, %v2304_v62 }
 0x16d   : > { %v1405_v59 = vadd.f32 %v3160_v27, %v1197_v29  ;;  %v1200_v60 = vadd.f32 %v2394_v56, %v3168_v49  ;;  %2506 = vmatmul.mubr.bf16.gmra.mrb[52].mxu0 %v1464_v58 }
 0x16f   : > { %v1406_v1 = vadd.f32 %v3160_v27, %v1200_v60  ;;  %v2395_v2 = vpop.f32.mrb[36].mxu1  ;;  %v1437_v8 = vmax.f32 %v1405_v59, 0.0  ;;  %v2307_v23 = vpop.f32.mrb[36].mxu0 }
 0x170   : > { %v2396_v6 = vpop.f32.mrb[37].mxu1  ;;  %v2308_v28 = vpop.f32.mrb[37].mxu0 }
 0x171   : > { %v1438_v11 = vmax.f32 %v1406_v1, 0.0  ;;  %v2397_v4 = vadd.f32 %v2396_v6, %v2395_v2  ;;  %v2398_v39 = vpop.f32.mrb[38].mxu1  ;;  %v3202_v31 = vadd.f32 %v2308_v28, %v2307_v23  ;;  %v2310_v32 = vpop.f32.mrb[38].mxu0 }
 0x172   : > { %v2399_v14 = vpop.f32.mrb[39].mxu1  ;;  %v2311_v35 = vpop.f32.mrb[39].mxu0 }
 0x173   : > { %v1205_v49 = vadd.f32 %v2397_v4, %v3172_v63  ;;  %v2400_v18 = vadd.f32 %v2399_v14, %v2398_v39  ;;  %v1465_v19 = vpack.c.bf16 %v1438_v11, %v1437_v8  ;;  %v2312_v37 = vadd.f32 %v2311_v35, %v2310_v32 }
 0x175   : > { %v1407_v20 = vadd.f32 %v3160_v27, %v1205_v49  ;;  %v1208_v21 = vadd.f32 %v2400_v18, %v3174_v9  ;;  %2509 = vmatprep.mubr.bf16.mxu0 %v1465_v19 }
 0x177   : > { %v1408_v25 = vadd.f32 %v3160_v27, %v1208_v21  ;;  %v2401_v26 = vpop.f32.mrb[40].mxu1  ;;  %v1439_v10 = vmax.f32 %v1407_v20, 0.0  ;;  %v2313_v44 = vpop.f32.mrb[40].mxu0 }
 0x178   : > { %v2402_v30 = vpop.f32.mrb[41].mxu1  ;;  %v2314_v50 = vpop.f32.mrb[41].mxu0 }
 0x179   : > { %v1440_v16 = vmax.f32 %v1408_v25, 0.0  ;;  %v2403_v34 = vadd.f32 %v2402_v30, %v2401_v26  ;;  %v2404_v63 = vpop.f32.mrb[42].mxu1  ;;  %v2315_v22 = vadd.f32 %v2314_v50, %v2313_v44  ;;  %v2316_v53 = vpop.f32.mrb[42].mxu0 }
 0x17a   : > { %v2405_v36 = vpop.f32.mrb[43].mxu1 }
 0x17b   : > { %v1213_v38 = vadd.f32 %v2403_v34, %v3178_v24  ;;  %v2406_v9 = vadd.f32 %v2405_v36, %v2404_v63  ;;  %v1466_v40 = vpack.c.bf16 %v1440_v16, %v1439_v10  ;;  %v2317_v24 = vpop.f32.mrb[43].mxu0 }
 0x17c   : > { %v2318_v60 = vadd.f32 %v2317_v24, %v2316_v53 }
 0x17d   : > { %v1409_v41 = vadd.f32 %v3160_v27, %v1213_v38  ;;  %v1216_v43 = vadd.f32 %v2406_v9, %v3180_v33  ;;  %2510 = vmatmul.mubr.bf16.gmra.mrb[56].mxu0 %v1466_v40 }
 0x17f   : > { %v1410_v47 = vadd.f32 %v3160_v27, %v1216_v43  ;;  %v2407_v48 = vpop.f32.mrb[44].mxu1  ;;  %v1441_v54 = vmax.f32 %v1409_v41, 0.0  ;;  %v2319_v6 = vpop.f32.mrb[44].mxu0 }
 0x180   : > { %v2408_v51 = vpop.f32.mrb[45].mxu1  ;;  %v2320_v11 = vpop.f32.mrb[45].mxu0 }
 0x181   : > { %v1442_v29 = vmax.f32 %v1410_v47, 0.0  ;;  %v2409_v56 = vadd.f32 %v2408_v51, %v2407_v48  ;;  %v2410_v58 = vpop.f32.mrb[46].mxu1  ;;  %v2321_v39 = vadd.f32 %v2320_v11, %v2319_v6  ;;  %v2322_v13 = vpop.f32.mrb[46].mxu0 }
 0x182   : > { %v2411_v59 = vpop.f32.mrb[47].mxu1 }
 0x183   : > { %v1221_v61 = vadd.f32 %v2409_v56, %v3186_v46  ;;  %v2412_v1 = vadd.f32 %v2411_v59, %v2410_v58  ;;  %v1467_v33 = vpack.c.bf16 %v1442_v29, %v1441_v54  ;;  %v2323_v46 = vpop.f32.mrb[47].mxu0 }
 0x184   : > { %v2324_v21 = vadd.f32 %v2323_v46, %v2322_v13 }
 0x185   : > { %v1411_v2 = vadd.f32 %v3160_v27, %v1221_v61  ;;  %v1224_v3 = vadd.f32 %v2412_v1, %v3188_v55  ;;  %2513 = vmatprep.mubr.bf16.mxu0 %v1467_v33 }
 0x187   : > { %v1412_v62 = vadd.f32 %v3160_v27, %v1224_v3  ;;  %v2413_v8 = vpop.f32.mrb[48].mxu1  ;;  %v1443_v14 = vmax.f32 %v1411_v2, 0.0 }
 0x188   : > { %v2414_v4 = vpop.f32.mrb[49].mxu1 }
 0x189   : > { %v1444_v49 = vmax.f32 %v1412_v62, 0.0  ;;  %v2415_v18 = vadd.f32 %v2414_v4, %v2413_v8  ;;  %v2416_v19 = vpop.f32.mrb[50].mxu1 }
 0x18a   : > { %v2417_v20 = vpop.f32.mrb[51].mxu1 }
 0x18b   : > { %v1229_v23 = vadd.f32 %v2415_v18, %v3194_v7  ;;  %v2418_v25 = vadd.f32 %v2417_v20, %v2416_v19  ;;  %v1468_v55 = vpack.c.bf16 %v1444_v49, %v1443_v14 }
 0x18d   : > { %v1413_v26 = vadd.f32 %v3160_v27, %v1229_v23  ;;  %v1232_v28 = vadd.f32 %v2418_v25, %v3196_v15  ;;  %2514 = vmatmul.mubr.bf16.gmra.mrb[60].mxu0 %v1468_v55 }
 0x18f   : > { %v1414_v30 = vadd.f32 %v3160_v27, %v1232_v28  ;;  %v2419_v32 = vpop.f32.mrb[52].mxu1  ;;  %v1445_v16 = vmax.f32 %v1413_v26, 0.0 }
 0x190   : > { %v2420_v10 = vpop.f32.mrb[53].mxu1 }
 0x191   : > { %v1446_v34 = vmax.f32 %v1414_v30, 0.0  ;;  %v2421_v63 = vadd.f32 %v2420_v10, %v2419_v32  ;;  %v2422_v35 = vpop.f32.mrb[54].mxu1 }
 0x192   : > { %v2423_v36 = vpop.f32.mrb[55].mxu1 }
 0x193   : > { %v1237_v38 = vadd.f32 %v2421_v63, %v3202_v31  ;;  %v2424_v9 = vadd.f32 %v2423_v36, %v2422_v35  ;;  %v1469_v7 = vpack.c.bf16 %v1446_v34, %v1445_v16 }
 0x195   : > { %v1415_v40 = vadd.f32 %v3160_v27, %v1237_v38  ;;  %v1240_v41 = vadd.f32 %v2424_v9, %v2312_v37  ;;  %2517 = vmatprep.mubr.bf16.mxu0 %v1469_v7 }
 0x197   : > { %v1416_v15 = vadd.f32 %v3160_v27, %v1240_v41  ;;  %v2425_v43 = vpop.f32.mrb[56].mxu1  ;;  %v1447_v47 = vmax.f32 %v1415_v40, 0.0 }
 0x198   : > { %v2426_v44 = vpop.f32.mrb[57].mxu1 }
 0x199   : > { %v1448_v48 = vmax.f32 %v1416_v15, 0.0  ;;  %v2427_v50 = vadd.f32 %v2426_v44, %v2425_v43  ;;  %v2428_v51 = vpop.f32.mrb[58].mxu1 }
 0x19a   : > { %v2429_v53 = vpop.f32.mrb[59].mxu1 }
 0x19b   : > { %v1245_v54 = vadd.f32 %v2427_v50, %v2315_v22  ;;  %v2430_v29 = vadd.f32 %v2429_v53, %v2428_v51  ;;  %v1470_v56 = vpack.c.bf16 %v1448_v48, %v1447_v47 }
 0x19d   : > { %v1417_v31 = vadd.f32 %v3160_v27, %v1245_v54  ;;  %v1248_v58 = vadd.f32 %v2430_v29, %v2318_v60  ;;  %2518 = vmatmul.mubr.bf16.gmra.mrb[64].mxu0 %v1470_v56 }
 0x19f   : > { %v1418_v24 = vadd.f32 %v3160_v27, %v1248_v58  ;;  %v2431_v37 = vpop.f32.mrb[60].mxu1  ;;  %v1449_v61 = vmax.f32 %v1417_v31, 0.0 }
 0x1a0   : > { %v2432_v59 = vpop.f32.mrb[61].mxu1 }
 0x1a1   : > { %v1450_v1 = vmax.f32 %v1418_v24, 0.0  ;;  %v2433_v33 = vadd.f32 %v2432_v59, %v2431_v37  ;;  %v2434_v2 = vpop.f32.mrb[62].mxu1 }
 0x1a2   : > { %v2435_v3 = vpop.f32.mrb[63].mxu1 }
 0x1a3   : > { %v1253_v6 = vadd.f32 %v2433_v33, %v2321_v39  ;;  %v2436_v62 = vadd.f32 %v2435_v3, %v2434_v2  ;;  %v1471_v8 = vpack.c.bf16 %v1450_v1, %v1449_v61 }
 0x1a5   : > { %v1419_v22 = vadd.f32 %v3160_v27, %v1253_v6  ;;  %v1256_v11 = vadd.f32 %v2436_v62, %v2324_v21  ;;  %2521 = vmatprep.mubr.bf16.mxu0 %v1471_v8 }
 0x1a7   : > { %v1420_v4 = vadd.f32 %v3160_v27, %v1256_v11  ;;  %v2437_v60 = vpop.f32.mrb[64].mxu1  ;;  %v1451_v14 = vmax.f32 %v1419_v22, 0.0 }
 0x1a8   : > { %v2438_v13 = vpop.f32.mrb[65].mxu1 }
 0x1a9   : > { %v1452_v49 = vmax.f32 %v1420_v4, 0.0  ;;  %v2439_v18 = vadd.f32 %v2438_v13, %v2437_v60  ;;  %v2440_v19 = vpop.f32.mrb[66].mxu1 }
 0x1aa   : > { %v2441_v46 = vpop.f32.mrb[67].mxu1 }
 0x1ab   : > { %v1261_v20 = vadd.f32 %v2439_v18, %v3139_v42  ;;  %v2442_v23 = vadd.f32 %v2441_v46, %v2440_v19  ;;  %v1472_v25 = vpack.c.bf16 %v1452_v49, %v1451_v14 }
 0x1ad   : > { %v1421_v39 = vadd.f32 %v3160_v27, %v1261_v20  ;;  %v1264_v55 = vadd.f32 %v2442_v23, %v3141_v45  ;;  %2522 = vmatmul.mubr.bf16.gmra.mrb[68].mxu0 %v1472_v25 }
 0x1af   : > { %v1422_v21 = vadd.f32 %v3160_v27, %v1264_v55  ;;  %v2443_v26 = vpop.f32.mrb[68].mxu1  ;;  %v1453_v30 = vmax.f32 %v1421_v39, 0.0 }
 0x1b0   : > { %v2444_v28 = vpop.f32.mrb[69].mxu1 }
 0x1b1   : > { %v1454_v32 = vmax.f32 %v1422_v21, 0.0  ;;  %v2445_v10 = vadd.f32 %v2444_v28, %v2443_v26  ;;  %v2446_v16 = vpop.f32.mrb[70].mxu1 }
 0x1b2   : > { %v2447_v34 = vpop.f32.mrb[71].mxu1 }
 0x1b3   : > { %v1269_v63 = vadd.f32 %v2445_v10, %v3143_v52  ;;  %v2448_v35 = vadd.f32 %v2447_v34, %v2446_v16  ;;  %v1473_v42 = vpack.c.bf16 %v1454_v32, %v1453_v30 }
 0x1b5   : > { %v1423_v36 = vadd.f32 %v3160_v27, %v1269_v63  ;;  %v1272_v38 = vadd.f32 %v2448_v35, %v3145_v57  ;;  %2525 = vmatprep.mubr.bf16.mxu0 %v1473_v42 }
 0x1b7   : > { %v1424_v45 = vadd.f32 %v3160_v27, %v1272_v38  ;;  %v2449_v9 = vpop.f32.mrb[72].mxu1  ;;  %v1455_v40 = vmax.f32 %v1423_v36, 0.0 }
 0x1b8   : > { %v2450_v7 = vpop.f32.mrb[73].mxu1 }
 0x1b9   : > { %v1456_v41 = vmax.f32 %v1424_v45, 0.0  ;;  %v2451_v15 = vadd.f32 %v2450_v7, %v2449_v9  ;;  %v2452_v43 = vpop.f32.mrb[74].mxu1 }
 0x1ba   : > { %v2453_v44 = vpop.f32.mrb[75].mxu1 }
 0x1bb   : > { %v1277_v47 = vadd.f32 %v2451_v15, %v3147_v0  ;;  %v2454_v48 = vadd.f32 %v2453_v44, %v2452_v43  ;;  %v1474_v52 = vpack.c.bf16 %v1456_v41, %v1455_v40 }
 0x1bd   : > { %v1425_v50 = vadd.f32 %v3160_v27, %v1277_v47  ;;  %v1280_v51 = vadd.f32 %v2454_v48, %v3149_v5  ;;  %2526 = vmatmul.mubr.bf16.gmra.mrb[72].mxu0 %v1474_v52 }
 0x1bf   : > { %v1426_v57 = vadd.f32 %v3160_v27, %v1280_v51  ;;  %v2455_v53 = vpop.f32.mrb[76].mxu1  ;;  %v1457_v29 = vmax.f32 %v1425_v50, 0.0 }
 0x1c0   : > { %v2456_v54 = vpop.f32.mrb[77].mxu1 }
 0x1c1   : > { %v1458_v56 = vmax.f32 %v1426_v57, 0.0  ;;  %v2457_v31 = vadd.f32 %v2456_v54, %v2455_v53  ;;  %v2458_v58 = vpop.f32.mrb[78].mxu1 }
 0x1c2   : > { %v2459_v24 = vpop.f32.mrb[79].mxu1 }
 0x1c3   : > { %v1285_v37 = vadd.f32 %v2457_v31, %v3151_v12  ;;  %v2460_v0 = vadd.f32 %v2459_v24, %v2458_v58  ;;  %v1475_v59 = vpack.c.bf16 %v1458_v56, %v1457_v29 }
 0x1c5   : > { %v1427_v61 = vadd.f32 %v3160_v27, %v1285_v37  ;;  %v1288_v1 = vadd.f32 %v2460_v0, %v3153_v17  ;;  %2529 = vmatprep.mubr.bf16.mxu0 %v1475_v59 }
 0x1c7   : > { %v1428_v5 = vadd.f32 %v3160_v27, %v1288_v1  ;;  %v1459_v33 = vmax.f32 %v1427_v61, 0.0 }
 0x1c9   : > { %v1460_v2 = vmax.f32 %v1428_v5, 0.0 }
 0x1cb   : > { %v1476_v3 = vpack.c.bf16 %v1460_v2, %v1459_v33 }
 0x1cd   : > { %2530 = vmatmul.mubr.bf16.gmra.mrb[76].mxu0 %v1476_v3 }
 0x230   : > { %v2503_v6 = vpop.f32.mrb[48].mxu0 }
 0x231   : > { %v1575_v62 = vpop.f32.mrb[49].mxu0 }
 0x232   : > { %v2504_v12 = vpop.f32.mrb[50].mxu0 }
 0x233   : > { %v2150_v17 = vpack.c.bf16 %v2504_v12, %v2503_v6  ;;  %v1578_v27 = vpop.f32.mrb[51].mxu0 }
 0x234   : > { %v2145_v8 = vpack.c.bf16 %v1578_v27, %v1575_v62 }
 0x235   : > { %2222 = vst [vmem:[%s3243_s30 + $0x8] sm:$0xff] %v2150_v17  }
 0x236   : > { %2146 = vst [vmem:[%s3243_s30] sm:$0xff] %v2145_v8  }
 0x240   : > { %v2507_v22 = vpop.f32.mrb[52].mxu0 }
 0x241   : > { %v1591_v11 = vpop.f32.mrb[53].mxu0 }
 0x242   : > { %v2508_v4 = vpop.f32.mrb[54].mxu0 }
 0x243   : > { %v2160_v60 = vpack.c.bf16 %v2508_v4, %v2507_v22  ;;  %v1594_v13 = vpop.f32.mrb[55].mxu0 }
 0x244   : > { %v2155_v14 = vpack.c.bf16 %v1594_v13, %v1591_v11 }
 0x245   : > { %2224 = vst [vmem:[%s3243_s30 + $0x18] sm:$0xff] %v2160_v60  }
 0x246   : > { %2223 = vst [vmem:[%s3243_s30 + $0x10] sm:$0xff] %v2155_v14  }
 0x250   : > { %v2511_v49 = vpop.f32.mrb[56].mxu0 }
 0x251   : > { %v1607_v18 = vpop.f32.mrb[57].mxu0 }
 0x252   : > { %v2512_v19 = vpop.f32.mrb[58].mxu0 }
 0x253   : > { %v2170_v46 = vpack.c.bf16 %v2512_v19, %v2511_v49  ;;  %v1610_v20 = vpop.f32.mrb[59].mxu0 }
 0x254   : > { %v2165_v23 = vpack.c.bf16 %v1610_v20, %v1607_v18 }
 0x255   : > { %2226 = vst [vmem:[%s3243_s30 + $0x28] sm:$0xff] %v2170_v46  }
 0x256   : > { %2225 = vst [vmem:[%s3243_s30 + $0x20] sm:$0xff] %v2165_v23  }
 0x260   : > { %v2515_v25 = vpop.f32.mrb[60].mxu0 }
 0x261   : > { %v1623_v39 = vpop.f32.mrb[61].mxu0 }
 0x262   : > { %v2516_v55 = vpop.f32.mrb[62].mxu0 }
 0x263   : > { %v2180_v21 = vpack.c.bf16 %v2516_v55, %v2515_v25  ;;  %v1626_v26 = vpop.f32.mrb[63].mxu0 }
 0x264   : > { %v2175_v28 = vpack.c.bf16 %v1626_v26, %v1623_v39 }
 0x265   : > { %2228 = vst [vmem:[%s3243_s30 + $0x38] sm:$0xff] %v2180_v21  }
 0x266   : > { %2227 = vst [vmem:[%s3243_s30 + $0x30] sm:$0xff] %v2175_v28  }
 0x270   : > { %v2519_v30 = vpop.f32.mrb[64].mxu0 }
 0x271   : > { %v1639_v32 = vpop.f32.mrb[65].mxu0 }
 0x272   : > { %v2520_v10 = vpop.f32.mrb[66].mxu0 }
 0x273   : > { %v2190_v16 = vpack.c.bf16 %v2520_v10, %v2519_v30  ;;  %v1642_v34 = vpop.f32.mrb[67].mxu0 }
 0x274   : > { %v2185_v63 = vpack.c.bf16 %v1642_v34, %v1639_v32 }
 0x275   : > { %2230 = vst [vmem:[%s3243_s30 + $0x48] sm:$0xff] %v2190_v16  }
 0x276   : > { %2229 = vst [vmem:[%s3243_s30 + $0x40] sm:$0xff] %v2185_v63  }
 0x280   : > { %v2523_v35 = vpop.f32.mrb[68].mxu0 }
 0x281   : > { %v1655_v42 = vpop.f32.mrb[69].mxu0 }
 0x282   : > { %v2524_v36 = vpop.f32.mrb[70].mxu0 }
 0x283   : > { %v2200_v38 = vpack.c.bf16 %v2524_v36, %v2523_v35  ;;  %v1658_v45 = vpop.f32.mrb[71].mxu0 }
 0x284   : > { %v2195_v9 = vpack.c.bf16 %v1658_v45, %v1655_v42 }
 0x285   : > { %2232 = vst [vmem:[%s3243_s30 + $0x58] sm:$0xff] %v2200_v38  }
 0x286   : > { %2231 = vst [vmem:[%s3243_s30 + $0x50] sm:$0xff] %v2195_v9  }
 0x290   : > { %v2527_v7 = vpop.f32.mrb[72].mxu0 }
 0x291   : > { %v1671_v40 = vpop.f32.mrb[73].mxu0 }
 0x292   : > { %v2528_v41 = vpop.f32.mrb[74].mxu0 }
 0x293   : > { %v2210_v15 = vpack.c.bf16 %v2528_v41, %v2527_v7  ;;  %v1674_v43 = vpop.f32.mrb[75].mxu0 }
 0x294   : > { %v2205_v44 = vpack.c.bf16 %v1674_v43, %v1671_v40 }
 0x295   : > { %2234 = vst [vmem:[%s3243_s30 + $0x68] sm:$0xff] %v2210_v15  }
 0x296   : > { %2233 = vst [vmem:[%s3243_s30 + $0x60] sm:$0xff] %v2205_v44  }
 0x2a0   : > { %v2531_v47 = vpop.f32.mrb[76].mxu0 }
 0x2a1   : > { %v1687_v48 = vpop.f32.mrb[77].mxu0 }
 0x2a2   : > { %v2532_v52 = vpop.f32.mrb[78].mxu0 }
 0x2a3   : > { %v2220_v50 = vpack.c.bf16 %v2532_v52, %v2531_v47  ;;  %v1690_v51 = vpop.f32.mrb[79].mxu0 }
 0x2a4   : > { %v2215_v57 = vpack.c.bf16 %v1690_v51, %v1687_v48 }
 0x2a5   : > { %2236 = vst [vmem:[%s3243_s30 + $0x78] sm:$0xff] %v2220_v50  }
 0x2a6   : > { %2235 = vst [vmem:[%s3243_s30 + $0x70] sm:$0xff] %v2215_v57  }
 0x2a7 PF: > { %s17_s20 = sadd.s32 1, %s2822_s20   ;;  %s3287_s15 = smov %s2806_s16 }
 0x2a8   : > { %p14_p9 = scmp.ge.s32.totalorder %s17_s20, 4   ;;  %s3288_s16 = smov %s2810_s17 }
 0x2a9   : > { %s3289_s17 = smov %s2901_s27  ;;  %s3290_s18 = smov %s2818_s19 }
 0x2aa   : > { %s3291_s19 = smov %s3293_s22  ;;  %16 = sbr.rel (!%p14_p9) target bundleno = 4 (0x4), region = 87 }
 0x2b1   :  { %1884 = vsyncpa [#allocation4], 1 }
 0x2b2   :  { %1886 = vsyncpa [#allocation4 + $0x1], 1 }

</bundles_post_ra>
